<compile_context>
chip_gen: v5e
topology: v5e:2x2
jax: 0.10.0
libtpu: 0.0.40
codegen_flags: <defaults>
</compile_context>

<pallas_src>
import jax
import jax.numpy as jnp
from jax.experimental import pallas as pl
from jax.experimental.pallas import tpu as pltpu

EPS = 1e-5


def resblock_kernel(x_ref,
                    t1_ref, t2_ref, t3_ref,
                    b3_ref,
                    g1_ref, be1_ref, g2_ref, be2_ref, g3_ref, be3_ref,
                    sel_ref, selt_ref,
                    y_ref,
                    pad_ref):
    """Whole residual block in one invocation (toy shapes -> everything fits in VMEM).

    x_ref    : (N*H, W*C) f32     input, lane-dense (W*C = 128 here)
    t*_ref   : (3, W*C, W*C) bf16 block-tridiagonal conv weights (one matrix per kh tap)
    b3_ref   : (1, W*C) f32       conv3 bias, tiled over W
    g*,be*   : (1, W*C) f32       BatchNorm gamma/beta, tiled over W
    sel_ref  : (W*C, C) f32       0/1 matrix folding the W lane-groups into channels
    selt_ref : (C, W*C) f32       its transpose (broadcast per-channel values back to lanes)
    y_ref    : (N*H, W*C) f32     output
    pad_ref  : (N, H+2, W*C) bf16 scratch, padded in H only (W padding lives in t*)
    """
    N, Hp2, WC = pad_ref.shape
    H = Hp2 - 2
    C = sel_ref.shape[1]
    W = WC // C
    NH = N * H
    inv_n = 1.0 / float(N * H * W)

    def conv3x3(cur, t_ref):
        # cur: (N*H, W*C) f32 activation -> (N*H, W*C) f32 conv output (no bias)
        pad_ref[:, 1:H + 1, :] = cur.astype(jnp.bfloat16).reshape(N, H, WC)
        acc = jnp.zeros((NH, WC), jnp.float32)
        for kh in range(3):   # static unroll: 3 lane-dense K=W*C bf16 matmuls, f32 accumulate
            slab = pad_ref[:, kh:kh + H, :].reshape(NH, WC)
            acc = acc + jnp.dot(slab, t_ref[kh], preferred_element_type=jnp.float32)
        return acc

    def bn_relu(h, g_wc, be_wc):
        # training-mode BatchNorm2d (batch stats over N,H,W per channel) + ReLU, all f32
        s1 = jnp.sum(h, axis=0, keepdims=True)        # (1, W*C)
        s2 = jnp.sum(h * h, axis=0, keepdims=True)    # (1, W*C)
        # fold the W lane-groups -> per-channel sums, then broadcast back to lanes (MXU)
        mean = jnp.dot(jnp.dot(s1, sel_ref[...], preferred_element_type=jnp.float32),
                       selt_ref[...], preferred_element_type=jnp.float32) * inv_n
        msq = jnp.dot(jnp.dot(s2, sel_ref[...], preferred_element_type=jnp.float32),
                      selt_ref[...], preferred_element_type=jnp.float32) * inv_n
        var = msq - mean * mean                       # biased batch variance
        scale = g_wc * jax.lax.rsqrt(var + EPS)       # rsqrt -> EUP slot
        shift = be_wc - mean * scale
        return jnp.maximum(h * scale + shift, 0.0)

    x = x_ref[...]                                    # (N*H, W*C) f32

    # zero only the 1-row H halo, once; the interior is rewritten before every conv and
    # the halo stays zero across all three convs
    halo = jnp.zeros((N, 1, WC), jnp.bfloat16)
    pad_ref[:, 0:1, :] = halo
    pad_ref[:, H + 1:H + 2, :] = halo

    h = conv3x3(x, t1_ref)                  # b1 omitted: cancelled by BN mean subtraction
    h = bn_relu(h, g1_ref[...], be1_ref[...])
    h = conv3x3(h, t2_ref)                  # b2 omitted: cancelled by BN mean subtraction
    h = bn_relu(h, g2_ref[...], be2_ref[...])
    h = conv3x3(h, t3_ref) + b3_ref[...]    # conv3 keeps its bias (no BN afterwards)

    y_ref[...] = x + h                      # lane-dense (N*H, 128) unmasked store


def _conv_w_to_band(w, W):
    """(3,3,Cin,Cout) HWIO conv weight -> (3, W*Cin, W*Cout) block-tridiagonal matrices.

    T[kh][wi*Cin+ci, wo*Cout+co] = w[kh, wi-wo+1, ci, co] (zero outside the +/-1 band and
    outside [0,W)), so `row_slab @ T[kh]` is the zero-padded 1-D conv along W for tap kh.
    """
    KH, KW, Cin, Cout = w.shape
    mats = []
    for kh in range(KH):
        t = sum(jnp.kron(jnp.eye(W, k=1 - kw, dtype=w.dtype), w[kh, kw])
                for kw in range(KW))
        mats.append(t)
    return jnp.stack(mats, axis=0)


def residual_block(x, params):
    """x: (N, H, W, C) float32, NHWC.  params: dict of weights (see init_params)."""
    N, H, W, C = x.shape
    WC = W * C
    tile_wc = lambda v: jnp.tile(v.reshape(-1), (W,)).reshape(1, WC)  # channel -> lane layout

    t1 = _conv_w_to_band(params["w1"], W).astype(jnp.bfloat16)
    t2 = _conv_w_to_band(params["w2"], W).astype(jnp.bfloat16)
    t3 = _conv_w_to_band(params["w3"], W).astype(jnp.bfloat16)
    sel = jnp.tile(jnp.eye(C, dtype=jnp.float32), (W, 1))             # (W*C, C)
    selt = sel.T                                                      # (C, W*C)

    args = (x.reshape(N * H, WC),
            t1, t2, t3,
            tile_wc(params["b3"]),
            tile_wc(params["g1"]), tile_wc(params["be1"]),
            tile_wc(params["g2"]), tile_wc(params["be2"]),
            tile_wc(params["g3"]), tile_wc(params["be3"]),
            sel, selt)
    vmem = pl.BlockSpec(memory_space=pltpu.MemorySpace.VMEM)
    y2 = pl.pallas_call(
        resblock_kernel,
        out_shape=jax.ShapeDtypeStruct((N * H, WC), jnp.float32),
        in_specs=[vmem] * len(args),
        out_specs=vmem,
        scratch_shapes=[pltpu.VMEM((N, H + 2, WC), jnp.bfloat16)],
    )(*args)
    return y2.reshape(N, H, W, C)


def init_params(key, C):
    """Deterministic synthetic parameters (shapes match nn.Conv2d(C,C,3) / BatchNorm2d(C))."""
    ks = jax.random.split(key, 12)
    p = {}
    for i, name in enumerate(("1", "2", "3")):
        p["w" + name] = 0.1 * jax.random.normal(ks[4 * i + 0], (3, 3, C, C), jnp.float32)  # HWIO
        p["b" + name] = 0.1 * jax.random.normal(ks[4 * i + 1], (1, C), jnp.float32)
        p["g" + name] = 1.0 + 0.1 * jax.random.normal(ks[4 * i + 2], (1, C), jnp.float32)
        p["be" + name] = 0.1 * jax.random.normal(ks[4 * i + 3], (1, C), jnp.float32)
    return p


def reference_forward(x, p):
    """Pure-JAX f32 reference (NHWC), mirrors PyTorch training-mode forward (incl. b1/b2)."""
    def conv(h, w, b):
        y = jax.lax.conv_general_dilated(
            h, w, window_strides=(1, 1), padding=((1, 1), (1, 1)),
            dimension_numbers=("NHWC", "HWIO", "NHWC"),
            precision=jax.lax.Precision.HIGHEST)
        return y + b.reshape(1, 1, 1, -1)

    def bn_relu(h, g, be):
        mean = h.mean(axis=(0, 1, 2), keepdims=True)
        var = ((h - mean) ** 2).mean(axis=(0, 1, 2), keepdims=True)
        y = (h - mean) / jnp.sqrt(var + EPS) * g.reshape(1, 1, 1, -1) + be.reshape(1, 1, 1, -1)
        return jnp.maximum(y, 0.0)

    h = conv(x, p["w1"], p["b1"]); h = bn_relu(h, p["g1"], p["be1"])
    h = conv(h, p["w2"], p["b2"]); h = bn_relu(h, p["g2"], p["be2"])
    h = conv(h, p["w3"], p["b3"])
    return x + h


if __name__ == "__main__":
    N, H, W, C = 2, 16, 16, 8     # NHWC; W*C = 128 -> lane-dense working layout
    key = jax.random.PRNGKey(0)
    kx, kp = jax.random.split(key)
    x = jax.random.normal(kx, (N, H, W, C), jnp.float32)   # NHWC layout
    params = init_params(kp, C)

    y = jax.block_until_ready(residual_block(x, params))
    y_ref = jax.block_until_ready(reference_forward(x, params))

    assert y.shape == (N, H, W, C)
    err = float(jnp.max(jnp.abs(y - y_ref)))
    # tolerance accounts for bf16 MXU operands (f32 accumulation) vs. the f32 reference
    assert jnp.allclose(y, y_ref, rtol=3e-2, atol=3e-2), "max abs err = %e" % err
    print("KERNEL_OK")
</pallas_src>

<mosaic_0001>
module attributes {stable_mosaic.version = 11 : i64} {
  func.func @resblock_kernel(%arg0: memref<32x128xf32, #tpu.memory_space<vmem>>, %arg1: memref<3x128x128xbf16, #tpu.memory_space<vmem>>, %arg2: memref<3x128x128xbf16, #tpu.memory_space<vmem>>, %arg3: memref<3x128x128xbf16, #tpu.memory_space<vmem>>, %arg4: memref<1x128xf32, #tpu.memory_space<vmem>>, %arg5: memref<1x128xf32, #tpu.memory_space<vmem>>, %arg6: memref<1x128xf32, #tpu.memory_space<vmem>>, %arg7: memref<1x128xf32, #tpu.memory_space<vmem>>, %arg8: memref<1x128xf32, #tpu.memory_space<vmem>>, %arg9: memref<1x128xf32, #tpu.memory_space<vmem>>, %arg10: memref<1x128xf32, #tpu.memory_space<vmem>>, %arg11: memref<128x8xf32, #tpu.memory_space<vmem>>, %arg12: memref<8x128xf32, #tpu.memory_space<vmem>>, %arg13: memref<32x128xf32, #tpu.memory_space<vmem>>, %arg14: memref<2x18x128xbf16, #tpu.memory_space<vmem>>) attributes {dimension_semantics = [], scalar_prefetch = 0 : i64, scratch_operands = 1 : i64, tpu.core_type = #tpu.core_type<tc>} {
    %c0 = arith.constant 0 : index
    %c0_0 = arith.constant 0 : index
    %0 = vector.load %arg0[%c0, %c0_0] : memref<32x128xf32, #tpu.memory_space<vmem>>, vector<32x128xf32>
    %cst = arith.constant 0.000000e+00 : bf16
    %1 = vector.broadcast %cst : bf16 to vector<2x1x128xbf16>
    %c0_1 = arith.constant 0 : index
    %c0_2 = arith.constant 0 : index
    %c0_3 = arith.constant 0 : index
    %2 = vector.load %arg14[%c0_1, %c0_2, %c0_3] : memref<2x18x128xbf16, #tpu.memory_space<vmem>>, vector<2x1x128xbf16>
    tpu.vector_store %arg14[%c0_1, %c0_2, %c0_3], %1 {strides = array<i32>} : memref<2x18x128xbf16, #tpu.memory_space<vmem>>, vector<2x1x128xbf16>,
    %c0_4 = arith.constant 0 : index
    %c17 = arith.constant 17 : index
    %c0_5 = arith.constant 0 : index
    %3 = vector.load %arg14[%c0_4, %c17, %c0_5] : memref<2x18x128xbf16, #tpu.memory_space<vmem>>, vector<2x1x128xbf16>
    tpu.vector_store %arg14[%c0_4, %c17, %c0_5], %1 {strides = array<i32>} : memref<2x18x128xbf16, #tpu.memory_space<vmem>>, vector<2x1x128xbf16>,
    %4 = arith.truncf %0 : vector<32x128xf32> to vector<32x128xbf16>
    %5 = vector.shape_cast %4 : vector<32x128xbf16> to vector<2x16x128xbf16>
    %c0_6 = arith.constant 0 : index
    %c1 = arith.constant 1 : index
    %c0_7 = arith.constant 0 : index
    %6 = vector.load %arg14[%c0_6, %c1, %c0_7] : memref<2x18x128xbf16, #tpu.memory_space<vmem>>, vector<2x16x128xbf16>
    tpu.vector_store %arg14[%c0_6, %c1, %c0_7], %5 {strides = array<i32>} : memref<2x18x128xbf16, #tpu.memory_space<vmem>>, vector<2x16x128xbf16>,
    %cst_8 = arith.constant 0.000000e+00 : f32
    %7 = vector.broadcast %cst_8 : f32 to vector<32x128xf32>
    %c0_9 = arith.constant 0 : index
    %c0_10 = arith.constant 0 : index
    %c0_11 = arith.constant 0 : index
    %8 = vector.load %arg14[%c0_9, %c0_10, %c0_11] : memref<2x18x128xbf16, #tpu.memory_space<vmem>>, vector<2x16x128xbf16>
    %9 = vector.shape_cast %8 : vector<2x16x128xbf16> to vector<32x128xbf16>
    %c0_12 = arith.constant 0 : index
    %c0_13 = arith.constant 0 : index
    %c0_14 = arith.constant 0 : index
    %10 = vector.load %arg1[%c0_12, %c0_13, %c0_14] : memref<3x128x128xbf16, #tpu.memory_space<vmem>>, vector<1x128x128xbf16>
    %11 = vector.shape_cast %10 : vector<1x128x128xbf16> to vector<128x128xbf16>
    %cst_15 = arith.constant dense<0.000000e+00> : vector<32x128xf32>
    %12 = tpu.matmul %9, %11, %cst_15 {dimension_numbers = #tpu.dot_dimension_numbers<[1], [0], [0], [1], [0, 0, 1, 1], [], []>} : vector<32x128xbf16>, vector<128x128xbf16>, vector<32x128xf32> -> vector<32x128xf32>
    %13 = arith.addf %7, %12 : vector<32x128xf32>
    %c0_16 = arith.constant 0 : index
    %c1_17 = arith.constant 1 : index
    %c0_18 = arith.constant 0 : index
    %14 = vector.load %arg14[%c0_16, %c1_17, %c0_18] : memref<2x18x128xbf16, #tpu.memory_space<vmem>>, vector<2x16x128xbf16>
    %15 = vector.shape_cast %14 : vector<2x16x128xbf16> to vector<32x128xbf16>
    %c1_19 = arith.constant 1 : index
    %c0_20 = arith.constant 0 : index
    %c0_21 = arith.constant 0 : index
    %16 = vector.load %arg1[%c1_19, %c0_20, %c0_21] : memref<3x128x128xbf16, #tpu.memory_space<vmem>>, vector<1x128x128xbf16>
    %17 = vector.shape_cast %16 : vector<1x128x128xbf16> to vector<128x128xbf16>
    %cst_22 = arith.constant dense<0.000000e+00> : vector<32x128xf32>
    %18 = tpu.matmul %15, %17, %cst_22 {dimension_numbers = #tpu.dot_dimension_numbers<[1], [0], [0], [1], [0, 0, 1, 1], [], []>} : vector<32x128xbf16>, vector<128x128xbf16>, vector<32x128xf32> -> vector<32x128xf32>
    %19 = arith.addf %13, %18 : vector<32x128xf32>
    %c0_23 = arith.constant 0 : index
    %c2 = arith.constant 2 : index
    %c0_24 = arith.constant 0 : index
    %20 = vector.load %arg14[%c0_23, %c2, %c0_24] : memref<2x18x128xbf16, #tpu.memory_space<vmem>>, vector<2x16x128xbf16>
    %21 = vector.shape_cast %20 : vector<2x16x128xbf16> to vector<32x128xbf16>
    %c2_25 = arith.constant 2 : index
    %c0_26 = arith.constant 0 : index
    %c0_27 = arith.constant 0 : index
    %22 = vector.load %arg1[%c2_25, %c0_26, %c0_27] : memref<3x128x128xbf16, #tpu.memory_space<vmem>>, vector<1x128x128xbf16>
    %23 = vector.shape_cast %22 : vector<1x128x128xbf16> to vector<128x128xbf16>
    %cst_28 = arith.constant dense<0.000000e+00> : vector<32x128xf32>
    %24 = tpu.matmul %21, %23, %cst_28 {dimension_numbers = #tpu.dot_dimension_numbers<[1], [0], [0], [1], [0, 0, 1, 1], [], []>} : vector<32x128xbf16>, vector<128x128xbf16>, vector<32x128xf32> -> vector<32x128xf32>
    %25 = arith.addf %19, %24 : vector<32x128xf32>
    %c0_29 = arith.constant 0 : index
    %c0_30 = arith.constant 0 : index
    %26 = vector.load %arg5[%c0_29, %c0_30] : memref<1x128xf32, #tpu.memory_space<vmem>>, vector<1x128xf32>
    %c0_31 = arith.constant 0 : index
    %c0_32 = arith.constant 0 : index
    %27 = vector.load %arg6[%c0_31, %c0_32] : memref<1x128xf32, #tpu.memory_space<vmem>>, vector<1x128xf32>
    %cst_33 = arith.constant dense<0.000000e+00> : vector<128xf32>
    %28 = vector.multi_reduction <add>, %25, %cst_33 [0] : vector<32x128xf32> to vector<128xf32>
    %29 = vector.shape_cast %28 : vector<128xf32> to vector<1x128xf32>
    %30 = arith.mulf %25, %25 : vector<32x128xf32>
    %cst_34 = arith.constant dense<0.000000e+00> : vector<128xf32>
    %31 = vector.multi_reduction <add>, %30, %cst_34 [0] : vector<32x128xf32> to vector<128xf32>
    %32 = vector.shape_cast %31 : vector<128xf32> to vector<1x128xf32>
    %c0_35 = arith.constant 0 : index
    %c0_36 = arith.constant 0 : index
    %33 = vector.load %arg11[%c0_35, %c0_36] : memref<128x8xf32, #tpu.memory_space<vmem>>, vector<128x8xf32>
    %cst_37 = arith.constant dense<0.000000e+00> : vector<1x8xf32>
    %34 = tpu.matmul %29, %33, %cst_37 {dimension_numbers = #tpu.dot_dimension_numbers<[1], [0], [0], [1], [0, 0, 1, 1], [], []>} : vector<1x128xf32>, vector<128x8xf32>, vector<1x8xf32> -> vector<1x8xf32>
    %c0_38 = arith.constant 0 : index
    %c0_39 = arith.constant 0 : index
    %35 = vector.load %arg12[%c0_38, %c0_39] : memref<8x128xf32, #tpu.memory_space<vmem>>, vector<8x128xf32>
    %cst_40 = arith.constant dense<0.000000e+00> : vector<1x128xf32>
    %36 = tpu.matmul %34, %35, %cst_40 {dimension_numbers = #tpu.dot_dimension_numbers<[1], [0], [0], [1], [0, 0, 1, 1], [], []>} : vector<1x8xf32>, vector<8x128xf32>, vector<1x128xf32> -> vector<1x128xf32>
    %cst_41 = arith.constant 0.001953125 : f32
    %37 = vector.broadcast %cst_41 : f32 to vector<1x128xf32>
    %38 = arith.mulf %36, %37 : vector<1x128xf32>
    %c0_42 = arith.constant 0 : index
    %c0_43 = arith.constant 0 : index
    %39 = vector.load %arg11[%c0_42, %c0_43] : memref<128x8xf32, #tpu.memory_space<vmem>>, vector<128x8xf32>
    %cst_44 = arith.constant dense<0.000000e+00> : vector<1x8xf32>
    %40 = tpu.matmul %32, %39, %cst_44 {dimension_numbers = #tpu.dot_dimension_numbers<[1], [0], [0], [1], [0, 0, 1, 1], [], []>} : vector<1x128xf32>, vector<128x8xf32>, vector<1x8xf32> -> vector<1x8xf32>
    %c0_45 = arith.constant 0 : index
    %c0_46 = arith.constant 0 : index
    %41 = vector.load %arg12[%c0_45, %c0_46] : memref<8x128xf32, #tpu.memory_space<vmem>>, vector<8x128xf32>
    %cst_47 = arith.constant dense<0.000000e+00> : vector<1x128xf32>
    %42 = tpu.matmul %40, %41, %cst_47 {dimension_numbers = #tpu.dot_dimension_numbers<[1], [0], [0], [1], [0, 0, 1, 1], [], []>} : vector<1x8xf32>, vector<8x128xf32>, vector<1x128xf32> -> vector<1x128xf32>
    %cst_48 = arith.constant 0.001953125 : f32
    %43 = vector.broadcast %cst_48 : f32 to vector<1x128xf32>
    %44 = arith.mulf %42, %43 : vector<1x128xf32>
    %45 = arith.mulf %38, %38 : vector<1x128xf32>
    %46 = arith.subf %44, %45 : vector<1x128xf32>
    %cst_49 = arith.constant 9.99999974E-6 : f32
    %47 = vector.broadcast %cst_49 : f32 to vector<1x128xf32>
    %48 = arith.addf %46, %47 : vector<1x128xf32>
    %49 = math.rsqrt %48 : vector<1x128xf32>
    %50 = arith.mulf %26, %49 : vector<1x128xf32>
    %51 = arith.mulf %38, %50 : vector<1x128xf32>
    %52 = arith.subf %27, %51 : vector<1x128xf32>
    %53 = vector.broadcast %50 : vector<1x128xf32> to vector<32x128xf32>
    %54 = arith.mulf %25, %53 : vector<32x128xf32>
    %55 = vector.broadcast %52 : vector<1x128xf32> to vector<32x128xf32>
    %56 = arith.addf %54, %55 : vector<32x128xf32>
    %cst_50 = arith.constant 0.000000e+00 : f32
    %57 = vector.broadcast %cst_50 : f32 to vector<32x128xf32>
    %58 = arith.maximumf %56, %57 : vector<32x128xf32>
    %59 = arith.truncf %58 : vector<32x128xf32> to vector<32x128xbf16>
    %60 = vector.shape_cast %59 : vector<32x128xbf16> to vector<2x16x128xbf16>
    %c0_51 = arith.constant 0 : index
    %c1_52 = arith.constant 1 : index
    %c0_53 = arith.constant 0 : index
    %61 = vector.load %arg14[%c0_51, %c1_52, %c0_53] : memref<2x18x128xbf16, #tpu.memory_space<vmem>>, vector<2x16x128xbf16>
    tpu.vector_store %arg14[%c0_51, %c1_52, %c0_53], %60 {strides = array<i32>} : memref<2x18x128xbf16, #tpu.memory_space<vmem>>, vector<2x16x128xbf16>,
    %cst_54 = arith.constant 0.000000e+00 : f32
    %62 = vector.broadcast %cst_54 : f32 to vector<32x128xf32>
    %c0_55 = arith.constant 0 : index
    %c0_56 = arith.constant 0 : index
    %c0_57 = arith.constant 0 : index
    %63 = vector.load %arg14[%c0_55, %c0_56, %c0_57] : memref<2x18x128xbf16, #tpu.memory_space<vmem>>, vector<2x16x128xbf16>
    %64 = vector.shape_cast %63 : vector<2x16x128xbf16> to vector<32x128xbf16>
    %c0_58 = arith.constant 0 : index
    %c0_59 = arith.constant 0 : index
    %c0_60 = arith.constant 0 : index
    %65 = vector.load %arg2[%c0_58, %c0_59, %c0_60] : memref<3x128x128xbf16, #tpu.memory_space<vmem>>, vector<1x128x128xbf16>
    %66 = vector.shape_cast %65 : vector<1x128x128xbf16> to vector<128x128xbf16>
    %cst_61 = arith.constant dense<0.000000e+00> : vector<32x128xf32>
    %67 = tpu.matmul %64, %66, %cst_61 {dimension_numbers = #tpu.dot_dimension_numbers<[1], [0], [0], [1], [0, 0, 1, 1], [], []>} : vector<32x128xbf16>, vector<128x128xbf16>, vector<32x128xf32> -> vector<32x128xf32>
    %68 = arith.addf %62, %67 : vector<32x128xf32>
    %c0_62 = arith.constant 0 : index
    %c1_63 = arith.constant 1 : index
    %c0_64 = arith.constant 0 : index
    %69 = vector.load %arg14[%c0_62, %c1_63, %c0_64] : memref<2x18x128xbf16, #tpu.memory_space<vmem>>, vector<2x16x128xbf16>
    %70 = vector.shape_cast %69 : vector<2x16x128xbf16> to vector<32x128xbf16>
    %c1_65 = arith.constant 1 : index
    %c0_66 = arith.constant 0 : index
    %c0_67 = arith.constant 0 : index
    %71 = vector.load %arg2[%c1_65, %c0_66, %c0_67] : memref<3x128x128xbf16, #tpu.memory_space<vmem>>, vector<1x128x128xbf16>
    %72 = vector.shape_cast %71 : vector<1x128x128xbf16> to vector<128x128xbf16>
    %cst_68 = arith.constant dense<0.000000e+00> : vector<32x128xf32>
    %73 = tpu.matmul %70, %72, %cst_68 {dimension_numbers = #tpu.dot_dimension_numbers<[1], [0], [0], [1], [0, 0, 1, 1], [], []>} : vector<32x128xbf16>, vector<128x128xbf16>, vector<32x128xf32> -> vector<32x128xf32>
    %74 = arith.addf %68, %73 : vector<32x128xf32>
    %c0_69 = arith.constant 0 : index
    %c2_70 = arith.constant 2 : index
    %c0_71 = arith.constant 0 : index
    %75 = vector.load %arg14[%c0_69, %c2_70, %c0_71] : memref<2x18x128xbf16, #tpu.memory_space<vmem>>, vector<2x16x128xbf16>
    %76 = vector.shape_cast %75 : vector<2x16x128xbf16> to vector<32x128xbf16>
    %c2_72 = arith.constant 2 : index
    %c0_73 = arith.constant 0 : index
    %c0_74 = arith.constant 0 : index
    %77 = vector.load %arg2[%c2_72, %c0_73, %c0_74] : memref<3x128x128xbf16, #tpu.memory_space<vmem>>, vector<1x128x128xbf16>
    %78 = vector.shape_cast %77 : vector<1x128x128xbf16> to vector<128x128xbf16>
    %cst_75 = arith.constant dense<0.000000e+00> : vector<32x128xf32>
    %79 = tpu.matmul %76, %78, %cst_75 {dimension_numbers = #tpu.dot_dimension_numbers<[1], [0], [0], [1], [0, 0, 1, 1], [], []>} : vector<32x128xbf16>, vector<128x128xbf16>, vector<32x128xf32> -> vector<32x128xf32>
    %80 = arith.addf %74, %79 : vector<32x128xf32>
    %c0_76 = arith.constant 0 : index
    %c0_77 = arith.constant 0 : index
    %81 = vector.load %arg7[%c0_76, %c0_77] : memref<1x128xf32, #tpu.memory_space<vmem>>, vector<1x128xf32>
    %c0_78 = arith.constant 0 : index
    %c0_79 = arith.constant 0 : index
    %82 = vector.load %arg8[%c0_78, %c0_79] : memref<1x128xf32, #tpu.memory_space<vmem>>, vector<1x128xf32>
    %cst_80 = arith.constant dense<0.000000e+00> : vector<128xf32>
    %83 = vector.multi_reduction <add>, %80, %cst_80 [0] : vector<32x128xf32> to vector<128xf32>
    %84 = vector.shape_cast %83 : vector<128xf32> to vector<1x128xf32>
    %85 = arith.mulf %80, %80 : vector<32x128xf32>
    %cst_81 = arith.constant dense<0.000000e+00> : vector<128xf32>
    %86 = vector.multi_reduction <add>, %85, %cst_81 [0] : vector<32x128xf32> to vector<128xf32>
    %87 = vector.shape_cast %86 : vector<128xf32> to vector<1x128xf32>
    %c0_82 = arith.constant 0 : index
    %c0_83 = arith.constant 0 : index
    %88 = vector.load %arg11[%c0_82, %c0_83] : memref<128x8xf32, #tpu.memory_space<vmem>>, vector<128x8xf32>
    %cst_84 = arith.constant dense<0.000000e+00> : vector<1x8xf32>
    %89 = tpu.matmul %84, %88, %cst_84 {dimension_numbers = #tpu.dot_dimension_numbers<[1], [0], [0], [1], [0, 0, 1, 1], [], []>} : vector<1x128xf32>, vector<128x8xf32>, vector<1x8xf32> -> vector<1x8xf32>
    %c0_85 = arith.constant 0 : index
    %c0_86 = arith.constant 0 : index
    %90 = vector.load %arg12[%c0_85, %c0_86] : memref<8x128xf32, #tpu.memory_space<vmem>>, vector<8x128xf32>
    %cst_87 = arith.constant dense<0.000000e+00> : vector<1x128xf32>
    %91 = tpu.matmul %89, %90, %cst_87 {dimension_numbers = #tpu.dot_dimension_numbers<[1], [0], [0], [1], [0, 0, 1, 1], [], []>} : vector<1x8xf32>, vector<8x128xf32>, vector<1x128xf32> -> vector<1x128xf32>
    %cst_88 = arith.constant 0.001953125 : f32
    %92 = vector.broadcast %cst_88 : f32 to vector<1x128xf32>
    %93 = arith.mulf %91, %92 : vector<1x128xf32>
    %c0_89 = arith.constant 0 : index
    %c0_90 = arith.constant 0 : index
    %94 = vector.load %arg11[%c0_89, %c0_90] : memref<128x8xf32, #tpu.memory_space<vmem>>, vector<128x8xf32>
    %cst_91 = arith.constant dense<0.000000e+00> : vector<1x8xf32>
    %95 = tpu.matmul %87, %94, %cst_91 {dimension_numbers = #tpu.dot_dimension_numbers<[1], [0], [0], [1], [0, 0, 1, 1], [], []>} : vector<1x128xf32>, vector<128x8xf32>, vector<1x8xf32> -> vector<1x8xf32>
    %c0_92 = arith.constant 0 : index
    %c0_93 = arith.constant 0 : index
    %96 = vector.load %arg12[%c0_92, %c0_93] : memref<8x128xf32, #tpu.memory_space<vmem>>, vector<8x128xf32>
    %cst_94 = arith.constant dense<0.000000e+00> : vector<1x128xf32>
    %97 = tpu.matmul %95, %96, %cst_94 {dimension_numbers = #tpu.dot_dimension_numbers<[1], [0], [0], [1], [0, 0, 1, 1], [], []>} : vector<1x8xf32>, vector<8x128xf32>, vector<1x128xf32> -> vector<1x128xf32>
    %cst_95 = arith.constant 0.001953125 : f32
    %98 = vector.broadcast %cst_95 : f32 to vector<1x128xf32>
    %99 = arith.mulf %97, %98 : vector<1x128xf32>
    %100 = arith.mulf %93, %93 : vector<1x128xf32>
    %101 = arith.subf %99, %100 : vector<1x128xf32>
    %cst_96 = arith.constant 9.99999974E-6 : f32
    %102 = vector.broadcast %cst_96 : f32 to vector<1x128xf32>
    %103 = arith.addf %101, %102 : vector<1x128xf32>
    %104 = math.rsqrt %103 : vector<1x128xf32>
    %105 = arith.mulf %81, %104 : vector<1x128xf32>
    %106 = arith.mulf %93, %105 : vector<1x128xf32>
    %107 = arith.subf %82, %106 : vector<1x128xf32>
    %108 = vector.broadcast %105 : vector<1x128xf32> to vector<32x128xf32>
    %109 = arith.mulf %80, %108 : vector<32x128xf32>
    %110 = vector.broadcast %107 : vector<1x128xf32> to vector<32x128xf32>
    %111 = arith.addf %109, %110 : vector<32x128xf32>
    %cst_97 = arith.constant 0.000000e+00 : f32
    %112 = vector.broadcast %cst_97 : f32 to vector<32x128xf32>
    %113 = arith.maximumf %111, %112 : vector<32x128xf32>
    %114 = arith.truncf %113 : vector<32x128xf32> to vector<32x128xbf16>
    %115 = vector.shape_cast %114 : vector<32x128xbf16> to vector<2x16x128xbf16>
    %c0_98 = arith.constant 0 : index
    %c1_99 = arith.constant 1 : index
    %c0_100 = arith.constant 0 : index
    %116 = vector.load %arg14[%c0_98, %c1_99, %c0_100] : memref<2x18x128xbf16, #tpu.memory_space<vmem>>, vector<2x16x128xbf16>
    tpu.vector_store %arg14[%c0_98, %c1_99, %c0_100], %115 {strides = array<i32>} : memref<2x18x128xbf16, #tpu.memory_space<vmem>>, vector<2x16x128xbf16>,
    %cst_101 = arith.constant 0.000000e+00 : f32
    %117 = vector.broadcast %cst_101 : f32 to vector<32x128xf32>
    %c0_102 = arith.constant 0 : index
    %c0_103 = arith.constant 0 : index
    %c0_104 = arith.constant 0 : index
    %118 = vector.load %arg14[%c0_102, %c0_103, %c0_104] : memref<2x18x128xbf16, #tpu.memory_space<vmem>>, vector<2x16x128xbf16>
    %119 = vector.shape_cast %118 : vector<2x16x128xbf16> to vector<32x128xbf16>
    %c0_105 = arith.constant 0 : index
    %c0_106 = arith.constant 0 : index
    %c0_107 = arith.constant 0 : index
    %120 = vector.load %arg3[%c0_105, %c0_106, %c0_107] : memref<3x128x128xbf16, #tpu.memory_space<vmem>>, vector<1x128x128xbf16>
    %121 = vector.shape_cast %120 : vector<1x128x128xbf16> to vector<128x128xbf16>
    %cst_108 = arith.constant dense<0.000000e+00> : vector<32x128xf32>
    %122 = tpu.matmul %119, %121, %cst_108 {dimension_numbers = #tpu.dot_dimension_numbers<[1], [0], [0], [1], [0, 0, 1, 1], [], []>} : vector<32x128xbf16>, vector<128x128xbf16>, vector<32x128xf32> -> vector<32x128xf32>
    %123 = arith.addf %117, %122 : vector<32x128xf32>
    %c0_109 = arith.constant 0 : index
    %c1_110 = arith.constant 1 : index
    %c0_111 = arith.constant 0 : index
    %124 = vector.load %arg14[%c0_109, %c1_110, %c0_111] : memref<2x18x128xbf16, #tpu.memory_space<vmem>>, vector<2x16x128xbf16>
    %125 = vector.shape_cast %124 : vector<2x16x128xbf16> to vector<32x128xbf16>
    %c1_112 = arith.constant 1 : index
    %c0_113 = arith.constant 0 : index
    %c0_114 = arith.constant 0 : index
    %126 = vector.load %arg3[%c1_112, %c0_113, %c0_114] : memref<3x128x128xbf16, #tpu.memory_space<vmem>>, vector<1x128x128xbf16>
    %127 = vector.shape_cast %126 : vector<1x128x128xbf16> to vector<128x128xbf16>
    %cst_115 = arith.constant dense<0.000000e+00> : vector<32x128xf32>
    %128 = tpu.matmul %125, %127, %cst_115 {dimension_numbers = #tpu.dot_dimension_numbers<[1], [0], [0], [1], [0, 0, 1, 1], [], []>} : vector<32x128xbf16>, vector<128x128xbf16>, vector<32x128xf32> -> vector<32x128xf32>
    %129 = arith.addf %123, %128 : vector<32x128xf32>
    %c0_116 = arith.constant 0 : index
    %c2_117 = arith.constant 2 : index
    %c0_118 = arith.constant 0 : index
    %130 = vector.load %arg14[%c0_116, %c2_117, %c0_118] : memref<2x18x128xbf16, #tpu.memory_space<vmem>>, vector<2x16x128xbf16>
    %131 = vector.shape_cast %130 : vector<2x16x128xbf16> to vector<32x128xbf16>
    %c2_119 = arith.constant 2 : index
    %c0_120 = arith.constant 0 : index
    %c0_121 = arith.constant 0 : index
    %132 = vector.load %arg3[%c2_119, %c0_120, %c0_121] : memref<3x128x128xbf16, #tpu.memory_space<vmem>>, vector<1x128x128xbf16>
    %133 = vector.shape_cast %132 : vector<1x128x128xbf16> to vector<128x128xbf16>
    %cst_122 = arith.constant dense<0.000000e+00> : vector<32x128xf32>
    %134 = tpu.matmul %131, %133, %cst_122 {dimension_numbers = #tpu.dot_dimension_numbers<[1], [0], [0], [1], [0, 0, 1, 1], [], []>} : vector<32x128xbf16>, vector<128x128xbf16>, vector<32x128xf32> -> vector<32x128xf32>
    %135 = arith.addf %129, %134 : vector<32x128xf32>
    %c0_123 = arith.constant 0 : index
    %c0_124 = arith.constant 0 : index
    %136 = vector.load %arg4[%c0_123, %c0_124] : memref<1x128xf32, #tpu.memory_space<vmem>>, vector<1x128xf32>
    %137 = vector.broadcast %136 : vector<1x128xf32> to vector<32x128xf32>
    %138 = arith.addf %135, %137 : vector<32x128xf32>
    %139 = arith.addf %0, %138 : vector<32x128xf32>
    %c0_125 = arith.constant 0 : index
    %c0_126 = arith.constant 0 : index
    %140 = vector.load %arg13[%c0_125, %c0_126] : memref<32x128xf32, #tpu.memory_space<vmem>>, vector<32x128xf32>
    tpu.vector_store %arg13[%c0_125, %c0_126], %139 {strides = array<i32>} : memref<32x128xf32, #tpu.memory_space<vmem>>, vector<32x128xf32>,
    return
  }
}

</mosaic_0001>

<bundles_post_ra>
// kernel: tpu_custom_call.1
= control target key start
LH: loop header
LB: loop body
LE: loop exit
PB: predicated region body
PF: predicated region fallthrough
CT: control target
= control target key end

     0   :  { %18 = vsyncpa [#allocation4], 0  ;;  %s2734_s0 = inlined_call_operand.vmem [shape: f32[32,128], index: 0, kind: input, shape index: {}]   ;;  %s2735_s1 = inlined_call_operand.hbm [shape: bf16[3,128,128], index: 1, kind: input, shape index: {}]   ;;  %s2736_s2 = inlined_call_operand.hbm [shape: bf16[3,128,128], index: 2, kind: input, shape index: {}]   ;;  %s2737_s3 = inlined_call_operand.hbm [shape: bf16[3,128,128], index: 3, kind: input, shape index: {}]   ;;  %s2738_s4 = inlined_call_operand.vmem [shape: f32[1,128], index: 4, kind: input, shape index: {}]   ;;  %s2739_s5 = inlined_call_operand.vmem [shape: f32[1,128], index: 5, kind: input, shape index: {}]   ;;  %s2740_s6 = inlined_call_operand.vmem [shape: f32[1,128], index: 6, kind: input, shape index: {}]   ;;  %s2741_s7 = inlined_call_operand.vmem [shape: f32[1,128], index: 7, kind: input, shape index: {}]   ;;  %s2742_s8 = inlined_call_operand.vmem [shape: f32[1,128], index: 8, kind: input, shape index: {}]   ;;  %s2743_s9 = inlined_call_operand.vmem [shape: f32[1,128], index: 9, kind: input, shape index: {}]   ;;  %s2744_s10 = inlined_call_operand.vmem [shape: f32[1,128], index: 10, kind: input, shape index: {}]   ;;  %s2745_s11 = inlined_call_operand.vmem [shape: f32[128,8], index: 11, kind: input, shape index: {}]   ;;  %s2746_s12 = inlined_call_operand.vmem [shape: f32[8,128], index: 12, kind: input, shape index: {}]   ;;  %s2747_s13 = inlined_call_operand.hbm [shape: f32[32,128], index: 13, kind: output, shape index: {}]  }
   0x1   :  { %19 = vsyncpa [#allocation7], 0 }
   0x2   :  { %20 = vsyncpa [#allocation5], 0  ;;  %s40_s27 = sshll.u32 %s2736_s2, 4  ;;  %s2249_s9 = smov [#allocation6]   ;;  %s41_s27 = int_to_ptr.hbm [resolvable:$true] %s40_s27 }
   0x3   :  { %s42_s28 = sshll.u32 %s2249_s9, 4  ;;  %s27_s30 = sshll.u32 %s2735_s1, 4  ;;  %s43_s28 = int_to_ptr.vmem [resolvable:$true] %s42_s28  ;;  %s28_s30 = int_to_ptr.hbm [resolvable:$true] %s27_s30 }
   0x4   :  { %s2250_s14 = smov 64   ;;  %s2251_s15 = smov 4  }
   0x5   :  { %48 = dma.hbm_to_vmem [thread:$0]  %s41_s27, 3072, %s43_s28, [#allocation7], %s2250_s14, %s2250_s14, %s2251_s15  }
   0x6   :  { %s2252_s16 = smov [#allocation3]   ;;  %s53_s20 = sshll.u32 %s2737_s3, 4  ;;  %s54_s20 = int_to_ptr.hbm [resolvable:$true] %s53_s20 }
   0x7   :  { %s29_s17 = sshll.u32 %s2252_s16, 4  ;;  %s2253_s2 = smov [#allocation8]   ;;  %s30_s17 = int_to_ptr.vmem [resolvable:$true] %s29_s17 }
   0x8   :  { %35 = dma.hbm_to_vmem [thread:$0]  %s28_s30, 3072, %s30_s17, [#allocation4], %s2250_s14, %s2250_s14, %s2251_s15  }
   0x9   :  { %s55_s21 = sshll.u32 %s2253_s2, 4  ;;  %s56_s21 = int_to_ptr.vmem [resolvable:$true] %s55_s21 }
   0xa   :  { %61 = dma.hbm_to_vmem [thread:$0]  %s54_s20, 3072, %s56_s21, [#allocation7], %s2250_s14, %s2250_s14, %s2251_s15  }
   0xb   :  { %2243 = dma.done.wait [#allocation4], 3072  }
   0xc   :  { %2244 = vsyncadd [#allocation4], 4294964224 }
   0xd   :  { %2245 = dma.done.wait [#allocation7], 6144  }
   0xe   :  { %2246 = vsyncadd [#allocation7], 4294961152  ;;  %v2069_v0 = vld [vmem:[#allocation3 + $0x78] sm:$0xff]  ;;  %vm97_vm0 = vcmask 1040384   ;;  %vm98_vm1 = vsmask.f32 256 }
   0xf   :  { %v2061_v1 = vld [vmem:[#allocation3 + $0x38] sm:$0xff]  ;;  %vm106_vm2 = vsmask.f32 7938  ;;  %322 = vmatpush.bf16.msra.mxu0 %v2069_v0  ;;  %v2068_v2 = vld [vmem:[#allocation3 + $0x70] sm:$0xff]  ;;  %vm2337_vm3 = vmand %vm97_vm0, %vm98_vm1  ;;  %vm118_vm5 = vsmask.f32 4368 }
  0x10   :  { %401 = vmatpush.bf16.msra.mxu1 %v2061_v1  ;;  %v2060_v3 = vld [vmem:[#allocation3 + $0x30] sm:$0xff]  ;;  %vm2342_vm4 = vmand %vm97_vm0, %vm106_vm2  ;;  %v2067_v6 = vld [vmem:[#allocation3 + $0x68] sm:$0xff]  ;;  %vm160_vm6 = vcmask 1043456   ;;  %vm198_vm9 = vsmask.f32 3328  ;;  %vm426_vm12 = vcmask 1042432  }
  0x11   :  { %v93_v7 = vld [vmem:[%s2734_s0] sm:$0xff]  ;;  %v94_v8 = vld [vmem:[%s2734_s0 + $0x8] sm:$0xff]  ;;  %v2066_v16 = vld [vmem:[#allocation3 + $0x60] sm:$0xff]  ;;  %vm199_vm10 = vsmask.f32 7440  ;;  %vm427_vm13 = vcmask 1046532  }
  0x12   :  { %v2059_v9 = vld [vmem:[#allocation3 + $0x28] sm:$0xff]  ;;  %v108_v11 = vld [vmem:[#allocation2 + $0x8] sm:$0x1]  ;;  %v114_v12 = vpack.c.bf16 %v93_v7, %v93_v7  ;;  %v115_v13 = vpack.c.bf16 %v94_v8, %v94_v8  ;;  %v95_v21 = vld [vmem:[%s2734_s0 + $0x10] sm:$0xff]  ;;  %vm600_vm15 = vcmask 64512   ;;  %s2254_s27 = smov [#allocation9]  }
  0x13   :  { %323 = vmatpush.bf16.msra.mxu0 %v2068_v2  ;;  %v100_v10 = vld [vmem:[#allocation2] sm:$0x1]  ;;  %v109_v15 = vsel %vm2342_vm4, 0, %v108_v11  ;;  %v96_v22 = vld [vmem:[%s2734_s0 + $0x18] sm:$0xff]  ;;  %v103_v23 = vld [vmem:[#allocation2 + $0xc] sm:$0x1]  ;;  %v116_v29 = vpack.c.bf16 %v95_v21, %v95_v21 }
  0x14   :  { %402 = vmatpush.bf16.msra.mxu1 %v2060_v3  ;;  %v101_v14 = vsel %vm2337_vm3, 0, %v100_v10  ;;  %v121_v17 = vshrl.u32 %v114_v12, 16  ;;  %v124_v18 = vshll.u32 %v114_v12, 16  ;;  %v129_v19 = vshrl.u32 %v115_v13, 16  ;;  %110 = vst [vmem:[#allocation2 + $0x8] sm:$0x1] %v109_v15  ;;  %vm2366_vm7 = vmor %vm98_vm1, %vm118_vm5 }
  0x15   :  { %102 = vst [vmem:[#allocation2] sm:$0x1] %v101_v14  ;;  %v132_v20 = vshll.u32 %v115_v13, 16  ;;  %v2058_v24 = vld [vmem:[#allocation3 + $0x20] sm:$0xff]  ;;  %v104_v27 = vsel %vm2337_vm3, 0, %v103_v23  ;;  %v117_v32 = vpack.c.bf16 %v96_v22, %v96_v22  ;;  %vm2374_vm8 = vmand %vm160_vm6, %vm106_vm2  ;;  %v138_v38 = vshrl.u32 %v116_v29, 16 }
  0x16   :  { %v123_v25 = vrot.slane %v121_v17, 7  ;;  %v131_v26 = vrot.slane %v129_v19, 7  ;;  %v111_v28 = vld [vmem:[#allocation2 + $0x14] sm:$0x1]  ;;  %105 = vst [vmem:[#allocation2 + $0xc] sm:$0x1] %v104_v27  ;;  %vm2403_vm11 = vmor %vm198_vm9, %vm199_vm10 }
  0x17   :  { %324 = vmatpush.bf16.msra.mxu0 %v2067_v6  ;;  %v112_v31 = vsel %vm2342_vm4, 0, %v111_v28  ;;  %v141_v39 = vshll.u32 %v116_v29, 16  ;;  %v146_v40 = vshrl.u32 %v117_v32, 16  ;;  %v149_v41 = vshll.u32 %v117_v32, 16  ;;  %v2065_v42 = vld [vmem:[#allocation3 + $0x58] sm:$0xff]  ;;  %v2064_v50 = vld [vmem:[#allocation3 + $0x50] sm:$0xff]  ;;  %vm2421_vm14 = vmor %vm426_vm12, %vm427_vm13 }
  0x18   :  { %403 = vmatpush.bf16.msra.mxu1 %v2059_v9  ;;  %v126_v33 = vor.u32 %v124_v18, %v123_v25  ;;  %v127_v34 = vrot.slane %v123_v25, 4  ;;  %v134_v35 = vor.u32 %v132_v20, %v131_v26  ;;  %v136_v36 = vrot.slane %v131_v26, 4  ;;  %113 = vst [vmem:[#allocation2 + $0x14] sm:$0x1] %v112_v31  ;;  %v2057_v43 = vld [vmem:[#allocation3 + $0x18] sm:$0xff]  ;;  %v2056_v55 = vld [vmem:[#allocation3 + $0x10] sm:$0xff] }
  0x19   :  { %v140_v46 = vrot.slane %v138_v38, 7  ;;  %v148_v47 = vrot.slane %v146_v40, 7  ;;  %v2063_v62 = vld [vmem:[#allocation3 + $0x48] sm:$0xff]  ;;  %v2062_v10 = vld [vmem:[#allocation3 + $0x40] sm:$0xff]  ;;  %s1714_s9 = sshll.u32 %s2254_s27, 4  ;;  %s1716_s29 = sshll.u32 %s2747_s13, 4  ;;  %s1715_s9 = int_to_ptr.vmem [resolvable:$true] %s1714_s9  ;;  %s1717_s29 = int_to_ptr.hbm [resolvable:$true] %s1716_s29 }
  0x1a   :  { %v135_v44 = vsel %vm2366_vm7, %v127_v34, %v134_v35  ;;  %v2055_v63 = vld [vmem:[#allocation3 + $0x8] sm:$0xff]  ;;  %v2054_v11 = vld [vmem:[#allocation3] sm:$0xff]  ;;  %s2255_s15 = smov 128   ;;  %s2256_s16 = smov 8  }
  0x1b   :  { %325 = vmatpush.bf16.msra.mxu0 %v2066_v16  ;;  %165 = vst [vmem:[#allocation2 + $0x4] sm:$0xf] %v135_v44  ;;  %v166_v49 = vld [vmem:[#allocation2 + $0x8] sm:$0x1]  ;;  %v143_v52 = vor.u32 %v141_v39, %v140_v46  ;;  %v144_v53 = vrot.slane %v140_v46, 4  ;;  %v151_v54 = vor.u32 %v149_v41, %v148_v47  ;;  %v153_v56 = vrot.slane %v148_v47, 4 }
  0x1c   :  { %404 = vmatpush.bf16.msra.mxu1 %v2058_v24  ;;  %v162_v45 = vld [vmem:[#allocation2] sm:$0xf]  ;;  %v167_v51 = vsel %vm2337_vm3, %v136_v36, %v166_v49  ;;  %v2077_v16 = vld [vmem:[#allocation3 + $0xb8] sm:$0xff]  ;;  %v2074_v46 = vld [vmem:[#allocation3 + $0xa0] sm:$0xff] }
  0x1d   :  { %v163_v48 = vsel %vm2374_vm8, %v126_v33, %v162_v45  ;;  %168 = vst [vmem:[#allocation2 + $0x8] sm:$0x1] %v167_v51  ;;  %v169_v57 = vld [vmem:[#allocation2 + $0xc] sm:$0xf]  ;;  %v152_v58 = vsel %vm2366_vm7, %v144_v53, %v151_v54  ;;  %v2075_v41 = vld [vmem:[#allocation3 + $0xa8] sm:$0xff] }
  0x1e   :  { %164 = vst [vmem:[#allocation2] sm:$0xf] %v163_v48  ;;  %v170_v59 = vsel %vm2374_vm8, %v143_v52, %v169_v57  ;;  %v2076_v33 = vld [vmem:[#allocation3 + $0xb0] sm:$0xff]  ;;  %v2073_v52 = vld [vmem:[#allocation3 + $0x98] sm:$0xff] }
  0x1f   :  { %326 = vmatpush.bf16.msra.mxu0 %v2065_v42  ;;  %v173_v60 = vld [vmem:[#allocation2 + $0x14] sm:$0x1]  ;;  %171 = vst [vmem:[#allocation2 + $0xc] sm:$0xf] %v170_v59 }
  0x20   :  { %405 = vmatpush.bf16.msra.mxu1 %v2057_v43  ;;  %v174_v61 = vsel %vm2337_vm3, %v153_v56, %v173_v60  ;;  %172 = vst [vmem:[#allocation2 + $0x10] sm:$0xf] %v152_v58  ;;  %v2072_v56 = vld [vmem:[#allocation3 + $0x90] sm:$0xff]  ;;  %v2071_v58 = vld [vmem:[#allocation3 + $0x88] sm:$0xff] }
  0x21   :  { %175 = vst [vmem:[#allocation2 + $0x14] sm:$0x1] %v174_v61  ;;  %v2070_v61 = vld [vmem:[#allocation3 + $0x80] sm:$0xff] }
  0x22   :  { %v2390_v0 = vld [vmem:[#allocation2 + $0x4] sm:$0xf] }
  0x23   :  { %327 = vmatpush.bf16.msra.mxu0 %v2064_v50  ;;  %v211_v1 = vshll.u32 %v2390_v0, 16  ;;  %v215_v2 = vshrl.u32 %v2390_v0, 16  ;;  %v431_v59 = vrot.slane %v2390_v0, 5 }
  0x24   :  { %406 = vmatpush.bf16.msra.mxu1 %v2056_v55  ;;  %v2396_v5 = vld [vmem:[#allocation2 + $0x8] sm:$0x1] }
  0x25   :  { %v2394_v3 = vld [vmem:[#allocation2] sm:$0xf]  ;;  %v213_v8 = vrot.slane %v211_v1, 5  ;;  %v217_v9 = vrot.slane %v215_v2, 4  ;;  %v221_v12 = vshll.u32 %v2396_v5, 16  ;;  %v434_v1 = vrot.slane %v2396_v5, 5 }
  0x26   :  { %v202_v6 = vshrl.u32 %v2394_v3, 16  ;;  %v205_v7 = vshll.u32 %v2394_v3, 16  ;;  %v178_v17 = vld [vmem:[#allocation2 + $0xc] sm:$0xf]  ;;  %v2052_v25 = vld [vmem:[#allocation2] sm:$0xff] }
  0x27   :  { %328 = vmatpush.bf16.msra.mxu0 %v2063_v62  ;;  %v218_v15 = vor.u32 %v217_v9, %v213_v8  ;;  %v223_v19 = vrot.slane %v221_v12, 5  ;;  %v2407_v20 = vld [vmem:[#allocation2 + $0x10] sm:$0xf]  ;;  %v226_v21 = vshrl.u32 %v178_v17, 16  ;;  %v229_v22 = vshll.u32 %v178_v17, 16 }
  0x28   :  { %407 = vmatpush.bf16.msra.mxu1 %v2055_v63  ;;  %v204_v13 = vrot.slane %v202_v6, 4  ;;  %v207_v14 = vrot.slane %v205_v7, 5  ;;  %v235_v26 = vshll.u32 %v2407_v20, 16  ;;  %v239_v27 = vshrl.u32 %v2407_v20, 16  ;;  %v197_v38 = vld [vmem:[#allocation2 + $0x14] sm:$0x1] }
  0x29   :  { %v219_v24 = vrot.slane %v218_v15, 4  ;;  %v228_v28 = vrot.slane %v226_v21, 4  ;;  %v231_v29 = vrot.slane %v229_v22, 5  ;;  %v245_v44 = vshll.u32 %v197_v38, 16  ;;  %v2053_v53 = vld [vmem:[#allocation2 + $0xc] sm:$0xff] }
  0x2a   :  { %v208_v23 = vor.u32 %v207_v14, %v204_v13  ;;  %v237_v34 = vrot.slane %v235_v26, 5  ;;  %v241_v35 = vrot.slane %v239_v27, 4  ;;  %v420_v60 = vld [vmem:[#allocation2] sm:$0xe]  ;;  %v433_v63 = vrot.slane %v431_v59, 4  ;;  %v2467_v27 = vld [vmem:[%s2745_s11 + $0x58] sm:$0xff] }
  0x2b   :  { %329 = vmatpush.bf16.msra.mxu0 %v2062_v10  ;;  %v224_v32 = vsel %vm2403_vm11, %v219_v24, %v223_v19  ;;  %v232_v42 = vor.u32 %v231_v29, %v228_v28  ;;  %v247_v49 = vrot.slane %v245_v44, 5  ;;  %v1802_v62 = vrot.slane %v420_v60, 9  ;;  %v2453_v24 = vld [vmem:[%s2745_s11 + $0x68] sm:$0xff]  ;;  %v2474_v28 = vld [vmem:[%s2745_s11 + $0x50] sm:$0xff]  ;;  %v2542_v44 = vld [vmem:[%s2745_s11] sm:$0xff] }
  0x2c   :  { %408 = vmatpush.bf16.msra.mxu1 %v2054_v11  ;;  %v209_v31 = vrot.slane %v208_v23, 4  ;;  %v267_v36 = vunpack.c.l.b16 %v224_v32  ;;  %v242_v43 = vor.u32 %v241_v35, %v237_v34  ;;  %v435_v0 = vsel %vm2421_vm14, %v433_v63, %v434_v1  ;;  %v421_v11 = vld [vmem:[#allocation2 + $0xc] sm:$0xe]  ;;  %v2446_v23 = vld [vmem:[%s2745_s11 + $0x70] sm:$0xff]  ;;  %v2488_v32 = vld [vmem:[%s2745_s11 + $0x40] sm:$0xff] }
  0x2d   :  { %v233_v47 = vrot.slane %v232_v42, 4  ;;  %v432_v6 = vsel %vm2421_vm14, %v1802_v62, %v431_v59  ;;  %v438_v10 = vrot.slane %v2407_v20, 5  ;;  %v1803_v12 = vrot.slane %v421_v11, 9  ;;  %v2439_v20 = vld [vmem:[%s2745_s11 + $0x78] sm:$0xff]  ;;  %v2481_v29 = vld [vmem:[%s2745_s11 + $0x48] sm:$0xff]  ;;  %v2502_v35 = vld [vmem:[%s2745_s11 + $0x30] sm:$0xff] }
  0x2e   :  { %v214_v39 = vsel %vm2403_vm11, %v209_v31, %v213_v8  ;;  %v243_v48 = vrot.slane %v242_v43, 4  ;;  %v460_v7 = vunpack.c.l.b16 %v432_v6  ;;  %v461_v8 = vunpack.c.l.b16 %v435_v0  ;;  %579 = vmatpush.msra.mxu3 %v2439_v20  ;;  %v2530_v42 = vld [vmem:[%s2745_s11 + $0x10] sm:$0xff]  ;;  %v2535_v43 = vld [vmem:[%s2745_s11 + $0x8] sm:$0xff] }
  0x2f   :  { %516 = vmatpush.bf16.msrb.mxu0 %v2077_v16  ;;  %409 = vmatmul.bf16.vlgmr.msra.gmra.mxu1 %v2052_v25  ;;  %v266_v40 = vunpack.c.l.b16 %v214_v39  ;;  %v238_v50 = vsel %vm2403_vm11, %v233_v47, %v237_v34  ;;  %v440_v5 = vrot.slane %v438_v10, 4  ;;  %v441_v13 = vrot.slane %v197_v38, 5  ;;  %v2460_v25 = vld [vmem:[%s2745_s11 + $0x60] sm:$0xff]  ;;  %v2495_v34 = vld [vmem:[%s2745_s11 + $0x38] sm:$0xff] }
  0x30   :  { %v248_v51 = vsel %vm2403_vm11, %v243_v48, %v247_v49  ;;  %v268_v54 = vunpack.c.l.b16 %v238_v50  ;;  %v464_v9 = vpack.c.b16 %v461_v8, %v460_v7  ;;  %v439_v14 = vsel %vm2421_vm14, %v1803_v12, %v438_v10  ;;  %580 = vmatpush.msra.mxu3 %v2446_v23  ;;  %v2516_v38 = vld [vmem:[%s2745_s11 + $0x20] sm:$0xff] }
  0x31   :  { %v270_v45 = vpack.c.b16 %v267_v36, %v266_v40  ;;  %v269_v55 = vunpack.c.l.b16 %v248_v51  ;;  %v442_v15 = vsel %vm2421_vm14, %v440_v5, %v441_v13  ;;  %v462_v16 = vunpack.c.l.b16 %v439_v14  ;;  %v2509_v36 = vld [vmem:[%s2745_s11 + $0x28] sm:$0xff]  ;;  %v2552_v47 = vld [vmem:[%s2746_s12] sm:$0xff] }
  0x32   :  { %v463_v17 = vunpack.c.l.b16 %v442_v15  ;;  %581 = vmatpush.msra.mxu3 %v2453_v24 }
  0x33   :  { %517 = vmatpush.bf16.msrb.mxu0 %v2076_v33  ;;  %v271_v57 = vpack.c.b16 %v269_v55, %v268_v54 }
  0x34   :  { %330 = vmatmul.bf16.vlgmr.msra.gmra.mxu0 %v270_v45  ;;  %v465_v19 = vpack.c.b16 %v463_v17, %v462_v16  ;;  %582 = vmatpush.msra.mxu3 %v2460_v25 }
  0x36   :  { %583 = vmatpush.msra.mxu3 %v2467_v27 }
  0x37   :  { %518 = vmatpush.bf16.msrb.mxu0 %v2075_v41  ;;  %v2523_v41 = vld [vmem:[%s2745_s11 + $0x18] sm:$0xff] }
  0x38   :  { %584 = vmatpush.msra.mxu3 %v2474_v28 }
  0x3a   :  { %585 = vmatpush.msra.mxu3 %v2481_v29 }
  0x3b   :  { %519 = vmatpush.bf16.msrb.mxu0 %v2074_v46 }
  0x3c   :  { %586 = vmatpush.msra.mxu3 %v2488_v32 }
  0x3e   :  { %587 = vmatpush.msra.mxu3 %v2495_v34 }
  0x3f   :  { %520 = vmatpush.bf16.msrb.mxu0 %v2073_v52  ;;  %414 = vmatmul.bf16.gmra.mxu1 %v2053_v53 }
  0x40   :  { %588 = vmatpush.msra.mxu3 %v2502_v35 }
  0x42   :  { %589 = vmatpush.msra.mxu3 %v2509_v36 }
  0x43   :  { %521 = vmatpush.bf16.msrb.mxu0 %v2072_v56 }
  0x44   :  { %335 = vmatmul.bf16.gmra.mxu0 %v271_v57  ;;  %590 = vmatpush.msra.mxu3 %v2516_v38 }
  0x46   :  { %591 = vmatpush.msra.mxu3 %v2523_v41 }
  0x47   :  { %522 = vmatpush.bf16.msrb.mxu0 %v2071_v58 }
  0x48   :  { %592 = vmatpush.msra.mxu3 %v2530_v42 }
  0x4a   :  { %593 = vmatpush.msra.mxu3 %v2535_v43 }
  0x4b   :  { %523 = vmatpush.bf16.msrb.mxu0 %v2070_v61 }
  0x4c   :  { %594 = vmatpush.msra.mxu3 %v2542_v44 }
  0x4e   :  { %619 = vmatpush.msrb.mxu3 %v2552_v47 }
  0x4f   :  { %625 = vmatpush.msra.mxu0 %v2439_v20 }
  0x51   :  { %626 = vmatpush.msra.mxu0 %v2446_v23 }
  0x53   :  { %627 = vmatpush.msra.mxu0 %v2453_v24 }
  0x54   :  { %524 = vmatmul.bf16.vlgmr.msrb.gmra.mxu0 %v464_v9 }
  0x55   :  { %628 = vmatpush.msra.mxu0 %v2460_v25 }
  0x57   :  { %629 = vmatpush.msra.mxu0 %v2467_v27 }
  0x59   :  { %630 = vmatpush.msra.mxu0 %v2474_v28 }
  0x5b   :  { %631 = vmatpush.msra.mxu0 %v2481_v29 }
  0x5d   :  { %632 = vmatpush.msra.mxu0 %v2488_v32 }
  0x5f   :  { %633 = vmatpush.msra.mxu0 %v2495_v34 }
  0x61   :  { %634 = vmatpush.msra.mxu0 %v2502_v35 }
  0x63   :  { %635 = vmatpush.msra.mxu0 %v2509_v36 }
  0x64   :  { %529 = vmatmul.bf16.gmra.mxu0 %v465_v19 }
  0x65   :  { %636 = vmatpush.msra.mxu0 %v2516_v38 }
  0x67   :  { %637 = vmatpush.msra.mxu0 %v2523_v41 }
  0x69   :  { %638 = vmatpush.msra.mxu0 %v2530_v42 }
  0x6b   :  { %639 = vmatpush.msra.mxu0 %v2535_v43 }
  0x6d   :  { %640 = vmatpush.msra.mxu0 %v2542_v44 }
  0x6f   :  { %1157 = vmatpush.msrb.mxu0 %v2439_v20 }
  0x71   :  { %1158 = vmatpush.msrb.mxu0 %v2446_v23 }
  0x73   :  { %1159 = vmatpush.msrb.mxu0 %v2453_v24 }
  0x75   :  { %1160 = vmatpush.msrb.mxu0 %v2460_v25 }
  0x77   :  { %1161 = vmatpush.msrb.mxu0 %v2467_v27 }
  0x79   :  { %1162 = vmatpush.msrb.mxu0 %v2474_v28 }
  0x7b   :  { %1163 = vmatpush.msrb.mxu0 %v2481_v29 }
  0x7d   :  { %1164 = vmatpush.msrb.mxu0 %v2488_v32 }
  0x7f   :  { %1165 = vmatpush.msrb.mxu0 %v2495_v34 }
  0x81   :  { %1166 = vmatpush.msrb.mxu0 %v2502_v35 }
  0x83   :  { %1167 = vmatpush.msrb.mxu0 %v2509_v36 }
  0x85   :  { %1168 = vmatpush.msrb.mxu0 %v2516_v38 }
  0x87   :  { %1169 = vmatpush.msrb.mxu0 %v2523_v41 }
  0x89   :  { %1170 = vmatpush.msrb.mxu0 %v2530_v42 }
  0x8b   :  { %1171 = vmatpush.msrb.mxu0 %v2535_v43 }
  0x8d   :  { %1172 = vmatpush.msrb.mxu0 %v2542_v44 }
  0xac   :  { %v410_v31 = vpop.f32.mrf.mxu1 }
  0xb1   :  { %v2434_v21 = vpop.f32.mrf.mxu0 }
  0xb2   :  { %v411_v50 = vadd.f32 %v410_v31, %v2434_v21 }
  0xb4   :  { %v412_v39 = vpop.f32.mrf.mxu1 }
  0xb9   :  { %v333_v22 = vpop.f32.mrf.mxu0 }
  0xba   :  { %v413_v48 = vadd.f32 %v412_v39, %v333_v22 }
  0xbc   :  { %v415_v46 = vpop.f32.mrf.mxu1 }
  0xc1   :  { %v336_v26 = vpop.f32.mrf.mxu0 }
  0xc2   :  { %v416_v51 = vadd.f32 %v415_v46, %v336_v26 }
  0xc4   :  { %v417_v55 = vpop.f32.mrf.mxu1 }
  0xc9   :  { %v338_v33 = vpop.f32.mrf.mxu0 }
  0xca   :  { %v418_v57 = vadd.f32 %v417_v55, %v338_v33  ;;  %v2087_v33 = vld [vmem:[#allocation6 + $0x38] sm:$0xff] }
  0xcb   :  { %982 = vmatpush.bf16.msra.mxu2 %v2087_v33 }
  0xd1   :  { %v525_v40 = vpop.f32.mrf.mxu0 }
  0xd2   :  { %v2562_v53 = vadd.f32 %v525_v40, %v411_v50  ;;  %v2086_v40 = vld [vmem:[#allocation6 + $0x30] sm:$0xff]  ;;  %v2103_v50 = vld [vmem:[#allocation6 + $0xb8] sm:$0xff] }
  0xd3   :  { %983 = vmatpush.bf16.msra.mxu2 %v2086_v40 }
  0xd4   :  { %v550_v58 = vmul.f32 %v2562_v53, %v2562_v53 }
  0xd9   :  { %v527_v45 = vpop.f32.mrf.mxu0 }
  0xda   :  { %v2559_v52 = vadd.f32 %v527_v45, %v413_v48 }
  0xdc   :  { %v551_v56 = vmul.f32 %v2559_v52, %v2559_v52  ;;  %v541_v59 = vadd.f32 %v2559_v52, %v2562_v53 }
  0xde   :  { %v554_v62 = vadd.f32 %v551_v56, %v550_v58  ;;  %v2095_v56 = vld [vmem:[#allocation6 + $0x78] sm:$0xff]  ;;  %v2084_v58 = vld [vmem:[#allocation6 + $0x20] sm:$0xff] }
  0xdf   :  { %903 = vmatpush.bf16.msrb.mxu1 %v2095_v56 }
  0xe1   :  { %v530_v49 = vpop.f32.mrf.mxu0 }
  0xe2   :  { %v2564_v54 = vadd.f32 %v530_v49, %v416_v51  ;;  %v2085_v51 = vld [vmem:[#allocation6 + $0x28] sm:$0xff] }
  0xe3   :  { %984 = vmatpush.bf16.msra.mxu2 %v2085_v51 }
  0xe4   :  { %v552_v60 = vmul.f32 %v2564_v54, %v2564_v54  ;;  %v542_v63 = vadd.f32 %v541_v59, %v2564_v54  ;;  %v2094_v59 = vld [vmem:[#allocation6 + $0x70] sm:$0xff] }
  0xe5   :  { %904 = vmatpush.bf16.msrb.mxu1 %v2094_v59  ;;  %v2088_v59 = vld [vmem:[#allocation6 + $0x40] sm:$0xff] }
  0xe6   :  { %v555_v6 = vadd.f32 %v554_v62, %v552_v60  ;;  %v2101_v60 = vld [vmem:[#allocation6 + $0xa8] sm:$0xff] }
  0xe7   :  { %985 = vmatpush.bf16.msra.mxu2 %v2084_v58 }
  0xe9   :  { %v532_v61 = vpop.f32.mrf.mxu0 }
  0xea   :  { %v2578_v1 = vadd.f32 %v532_v61, %v418_v57  ;;  %v2102_v57 = vld [vmem:[#allocation6 + $0xb0] sm:$0xff]  ;;  %v2083_v61 = vld [vmem:[#allocation6 + $0x18] sm:$0xff] }
  0xeb   :  { %986 = vmatpush.bf16.msra.mxu2 %v2083_v61 }
  0xec   :  { %v543_v0 = vadd.f32 %v542_v63, %v2578_v1  ;;  %v553_v7 = vmul.f32 %v2578_v1, %v2578_v1 }
  0xee   :  { %v544_v8 = vrot.slane %v543_v0, 4  ;;  %v556_v9 = vadd.f32 %v555_v6, %v553_v7  ;;  %v2093_v6 = vld [vmem:[#allocation6 + $0x68] sm:$0xff] }
  0xef   :  { %905 = vmatpush.bf16.msrb.mxu1 %v2093_v6 }
  0xf0   :  { %v557_v10 = vrot.slane %v556_v9, 4  ;;  %v545_v11 = vadd.f32 %v544_v8, %v543_v0  ;;  %v2100_v0 = vld [vmem:[#allocation6 + $0xa0] sm:$0xff]  ;;  %v2082_v8 = vld [vmem:[#allocation6 + $0x10] sm:$0xff] }
  0xf1   :  { %987 = vmatpush.bf16.msra.mxu2 %v2082_v8 }
  0xf2   :  { %v558_v12 = vadd.f32 %v557_v10, %v556_v9  ;;  %v546_v5 = vrot.slane %v545_v11, 2  ;;  %v2092_v10 = vld [vmem:[#allocation6 + $0x60] sm:$0xff] }
  0xf3   :  { %906 = vmatpush.bf16.msrb.mxu1 %v2092_v10 }
  0xf4   :  { %v559_v13 = vrot.slane %v558_v12, 2  ;;  %v547_v14 = vadd.f32 %v546_v5, %v545_v11  ;;  %v2099_v11 = vld [vmem:[#allocation6 + $0x98] sm:$0xff] }
  0xf6   :  { %v548_v15 = vrot.slane %v547_v14, 1  ;;  %v560_v16 = vadd.f32 %v559_v13, %v558_v12  ;;  %v2081_v12 = vld [vmem:[#allocation6 + $0x8] sm:$0xff]  ;;  %v2091_v13 = vld [vmem:[#allocation6 + $0x58] sm:$0xff] }
  0xf7   :  { %988 = vmatpush.bf16.msra.mxu2 %v2081_v12  ;;  %907 = vmatpush.bf16.msrb.mxu1 %v2091_v13 }
  0xf8   :  { %v549_v17 = vadd.f32 %v548_v15, %v547_v14  ;;  %v561_v19 = vrot.slane %v560_v16, 1  ;;  %v2098_v14 = vld [vmem:[#allocation6 + $0x90] sm:$0xff]  ;;  %v539_v15 = vld [vmem:[%s2739_s5] sm:$0x1] }
  0xfa   :  { %595 = vmatmul.f32.vlgmr.msra.gmra.mxu3 %v549_v17  ;;  %v562_v21 = vadd.f32 %v561_v19, %v560_v16  ;;  %v2080_v17 = vld [vmem:[#allocation6] sm:$0xff] }
  0xfb   :  { %663 = vmatpush.msra.mxu3 %v2552_v47  ;;  %989 = vmatpush.bf16.msra.mxu2 %v2080_v17 }
  0xfc   :  { %641 = vmatmul.f32.vlgmr.msra.gmra.mxu0 %v562_v21 }
  0xfd   :  { %1196 = vmatpush.msra.mxu0 %v2552_v47 }
  0xff   :  { %1202 = vmatpush.msrb.mxu2 %v2439_v20 }
 0x101   :  { %1203 = vmatpush.msrb.mxu2 %v2446_v23 }
 0x103   :  { %1204 = vmatpush.msrb.mxu2 %v2453_v24 }
 0x105   :  { %1205 = vmatpush.msrb.mxu2 %v2460_v25 }
 0x107   :  { %1206 = vmatpush.msrb.mxu2 %v2467_v27 }
 0x109   :  { %1207 = vmatpush.msrb.mxu2 %v2474_v28 }
 0x10b   :  { %1208 = vmatpush.msrb.mxu2 %v2481_v29 }
 0x10d   :  { %1209 = vmatpush.msrb.mxu2 %v2488_v32 }
 0x10f   :  { %1210 = vmatpush.msrb.mxu2 %v2495_v34 }
 0x111   :  { %1211 = vmatpush.msrb.mxu2 %v2502_v35 }
 0x113   :  { %1212 = vmatpush.msrb.mxu2 %v2509_v36 }
 0x115   :  { %1213 = vmatpush.msrb.mxu2 %v2516_v38 }
 0x117   :  { %1214 = vmatpush.msrb.mxu2 %v2523_v41 }
 0x119   :  { %1215 = vmatpush.msrb.mxu2 %v2530_v42 }
 0x11b   :  { %1216 = vmatpush.msrb.mxu2 %v2535_v43 }
 0x11d   :  { %1217 = vmatpush.msrb.mxu2 %v2542_v44 }
 0x179   :  { %v642_v26 = vpop.f32.mrf.mxu0 }
 0x17d   :  { %v596_v22 = vpop.f32.mrf.mxu3 }
 0x17e   :  { %1836 = vmatmul.msk.f32.vlgmr.msrb.gmra.mxu3 %vm600_vm15, %v596_v22  ;;  %v2090_v22 = vld [vmem:[#allocation6 + $0x50] sm:$0xff] }
 0x17f   :  { %1094 = vmatpush.bf16.msrb.mxu3 %v2103_v50  ;;  %908 = vmatpush.bf16.msrb.mxu1 %v2090_v22 }
 0x183   :  { %1095 = vmatpush.bf16.msrb.mxu3 %v2102_v57 }
 0x186   :  { %1837 = vmatmul.msk.f32.vlgmr.msra.gmra.mxu3 %vm600_vm15, %v642_v26  ;;  %v540_v26 = vld [vmem:[%s2740_s6] sm:$0x1] }
 0x187   :  { %1096 = vmatpush.bf16.msrb.mxu3 %v2101_v60 }
 0x18b   :  { %1097 = vmatpush.bf16.msrb.mxu3 %v2100_v0 }
 0x18f   :  { %1098 = vmatpush.bf16.msrb.mxu3 %v2099_v11 }
 0x193   :  { %1099 = vmatpush.bf16.msrb.mxu3 %v2098_v14 }
 0x201   :  { %v621_v31 = vpop.f32.mrf.mxu3 }
 0x202   :  { %v624_v39 = vmul.f32 0.001953125, %v621_v31  ;;  %v2097_v31 = vld [vmem:[#allocation6 + $0x88] sm:$0xff] }
 0x203   :  { %1100 = vmatpush.bf16.msrb.mxu3 %v2097_v31  ;;  %v757_v31 = vld [vmem:[#allocation2 + $0x14] sm:$0x1] }
 0x204   :  { %v669_v46 = vmul.f32 %v624_v39, %v624_v39 }
 0x209   :  { %v665_v45 = vpop.f32.mrf.mxu3 }
 0x20a   :  { %v668_v48 = vmul.f32 0.001953125, %v665_v45 }
 0x20c   :  { %v670_v49 = vsub.f32 %v668_v48, %v669_v46  ;;  %v2089_v46 = vld [vmem:[#allocation6 + $0x48] sm:$0xff] }
 0x20d   :  { %909 = vmatpush.bf16.msrb.mxu1 %v2089_v46 }
 0x20e   :  { %v671_v55 = vadd.f32 1e-05, %v670_v49  ;;  %v2096_v49 = vld [vmem:[#allocation6 + $0x80] sm:$0xff] }
 0x20f   :  { %1101 = vmatpush.bf16.msrb.mxu3 %v2096_v49 }
 0x210   :  { %2139 = vrsqrt.f32 %v671_v55  ;;  %vm678_vm1 = vweird.f32 %v671_v55 }
 0x211   :  { %910 = vmatpush.bf16.msrb.mxu1 %v2088_v59 }
 0x216   :  { %v2140_v62 = vpop.eup %2139 }
 0x217   :  { %v673_v63 = vmul.f32 %v2140_v62, %v671_v55  ;;  %vm679_vm0 = vweird.f32 %v2140_v62 }
 0x218   :  { %vm680_vm2 = vmor %vm678_vm1, %vm679_vm0 }
 0x219   :  { %v674_v7 = vmul.f32 %v2140_v62, %v673_v63 }
 0x21b   :  { %v675_v9 = vmul.f32 0.5, %v674_v7 }
 0x21d   :  { %v676_v5 = vsub.f32 1.5, %v675_v9 }
 0x21f   :  { %v677_v16 = vmul.f32 %v2140_v62, %v676_v5  ;;  %v750_v5 = vld [vmem:[#allocation2 + $0x8] sm:$0x1] }
 0x221   :  { %v681_v19 = vsel %vm680_vm2, %v2140_v62, %v677_v16  ;;  %v753_v16 = vld [vmem:[#allocation2 + $0xc] sm:$0xf] }
 0x222   :  { %v682_v21 = vmul.f32 %v681_v19, %v539_v15 }
 0x224   :  { %v683_v33 = vmul.f32 %v682_v21, %v624_v39  ;;  %v686_v40 = vperm.slane %v682_v21, 0 }
 0x226   :  { %v684_v45 = vsub.f32 %v540_v26, %v683_v33  ;;  %v688_v48 = vmul.f32 %v686_v40, %v2562_v53  ;;  %v689_v50 = vmul.f32 %v686_v40, %v2559_v52  ;;  %v690_v51 = vmul.f32 %v686_v40, %v2564_v54 }
 0x227   :  { %v691_v55 = vmul.f32 %v686_v40, %v2578_v1 }
 0x228   :  { %v693_v56 = vperm.slane %v684_v45, 0 }
 0x22a   :  { %v695_v39 = vadd.f32 %v693_v56, %v688_v48  ;;  %v696_v20 = vadd.f32 %v693_v56, %v689_v50  ;;  %v697_v57 = vadd.f32 %v693_v56, %v690_v51  ;;  %v698_v58 = vadd.f32 %v693_v56, %v691_v55 }
 0x22c   :  { %v699_v53 = vmax.f32 %v695_v39, 0.0  ;;  %v700_v23 = vmax.f32 %v696_v20, 0.0  ;;  %v701_v60 = vmax.f32 %v697_v57, 0.0  ;;  %v702_v52 = vmax.f32 %v698_v58, 0.0 }
 0x22e   :  { %v703_v54 = vpack.c.bf16 %v699_v53, %v699_v53  ;;  %v704_v1 = vpack.c.bf16 %v700_v23, %v700_v23  ;;  %v705_v61 = vpack.c.bf16 %v701_v60, %v701_v60  ;;  %v706_v62 = vpack.c.bf16 %v702_v52, %v702_v52 }
 0x230   :  { %v708_v24 = vshrl.u32 %v703_v54, 16  ;;  %v716_v63 = vshrl.u32 %v704_v1, 16  ;;  %v725_v6 = vshrl.u32 %v705_v61, 16  ;;  %v733_v0 = vshrl.u32 %v706_v62, 16 }
 0x231   :  { %v711_v7 = vshll.u32 %v703_v54, 16  ;;  %v719_v9 = vshll.u32 %v704_v1, 16  ;;  %v728_v11 = vshll.u32 %v705_v61, 16  ;;  %v736_v12 = vshll.u32 %v706_v62, 16 }
 0x232   :  { %v710_v25 = vrot.slane %v708_v24, 7  ;;  %v718_v8 = vrot.slane %v716_v63, 7  ;;  %v727_v10 = vrot.slane %v725_v6, 7  ;;  %v735_v27 = vrot.slane %v733_v0, 7 }
 0x234   :  { %v713_v13 = vor.u32 %v711_v7, %v710_v25  ;;  %v714_v14 = vrot.slane %v710_v25, 4  ;;  %v721_v28 = vor.u32 %v719_v9, %v718_v8  ;;  %v723_v15 = vrot.slane %v718_v8, 4 }
 0x235   :  { %v730_v17 = vor.u32 %v728_v11, %v727_v10  ;;  %v731_v19 = vrot.slane %v727_v10, 4  ;;  %v738_v21 = vor.u32 %v736_v12, %v735_v27  ;;  %v740_v29 = vrot.slane %v735_v27, 4 }
 0x236   :  { %v722_v22 = vsel %vm2366_vm7, %v714_v14, %v721_v28  ;;  %v747_v26 = vsel %vm2374_vm8, %v713_v13, %v2394_v3  ;;  %v751_v32 = vsel %vm2337_vm3, %v723_v15, %v750_v5 }
 0x237   :  { %752 = vst [vmem:[#allocation2 + $0x8] sm:$0x1] %v751_v32  ;;  %v754_v33 = vsel %vm2374_vm8, %v730_v17, %v753_v16  ;;  %v739_v34 = vsel %vm2366_vm7, %v731_v19, %v738_v21  ;;  %v758_v40 = vsel %vm2337_vm3, %v740_v29, %v757_v31 }
 0x238   :  { %748 = vst [vmem:[#allocation2] sm:$0xf] %v747_v26 }
 0x239   :  { %749 = vst [vmem:[#allocation2 + $0x4] sm:$0xf] %v722_v22 }
 0x23a   :  { %755 = vst [vmem:[#allocation2 + $0xc] sm:$0xf] %v754_v33 }
 0x23b   :  { %756 = vst [vmem:[#allocation2 + $0x10] sm:$0xf] %v739_v34 }
 0x23c   :  { %759 = vst [vmem:[#allocation2 + $0x14] sm:$0x1] %v758_v40 }
 0x23e   :  { %v780_v3 = vld [vmem:[#allocation2 + $0x8] sm:$0x1] }
 0x23f   :  { %v1001_v45 = vld [vmem:[#allocation2] sm:$0xe]  ;;  %v1012_v38 = vrot.slane %v780_v3, 5  ;;  %v802_v20 = vshll.u32 %v780_v3, 16 }
 0x240   :  { %v2631_v35 = vld [vmem:[#allocation2] sm:$0xf]  ;;  %v761_v48 = vld [vmem:[#allocation2 + $0x4] sm:$0xf]  ;;  %v1910_v49 = vrot.slane %v1001_v45, 9 }
 0x241   :  { %v2078_v46 = vld [vmem:[#allocation2] sm:$0xff]  ;;  %v783_v50 = vshrl.u32 %v2631_v35, 16  ;;  %v786_v36 = vshll.u32 %v2631_v35, 16  ;;  %v1009_v51 = vrot.slane %v761_v48, 5  ;;  %v792_v55 = vshll.u32 %v761_v48, 16 }
 0x242   :  { %v796_v56 = vshrl.u32 %v761_v48, 16  ;;  %990 = vmatmul.bf16.vlgmr.msra.gmra.mxu2 %v2078_v46  ;;  %v762_v23 = vld [vmem:[#allocation2 + $0xc] sm:$0xf]  ;;  %v763_v43 = vld [vmem:[#allocation2 + $0x10] sm:$0xf]  ;;  %v804_v6 = vrot.slane %v802_v20, 5 }
 0x243   :  { %v785_v41 = vrot.slane %v783_v50, 4  ;;  %v788_v39 = vrot.slane %v786_v36, 5  ;;  %v1010_v42 = vsel %vm2421_vm14, %v1910_v49, %v1009_v51  ;;  %v1011_v57 = vrot.slane %v1009_v51, 4  ;;  %v781_v14 = vld [vmem:[#allocation2 + $0x14] sm:$0x1]  ;;  %v2079_v26 = vld [vmem:[#allocation2 + $0xc] sm:$0xff] }
 0x244   :  { %v794_v58 = vrot.slane %v792_v55, 5  ;;  %v798_v59 = vrot.slane %v796_v56, 4  ;;  %v807_v54 = vshrl.u32 %v762_v23, 16  ;;  %v810_v1 = vshll.u32 %v762_v23, 16  ;;  %v1002_v28 = vld [vmem:[#allocation2 + $0xc] sm:$0xe] }
 0x245   :  { %v789_v53 = vor.u32 %v788_v39, %v785_v41  ;;  %v1013_v60 = vsel %vm2421_vm14, %v1011_v57, %v1012_v38  ;;  %v1038_v61 = vunpack.c.l.b16 %v1010_v42  ;;  %v1016_v7 = vrot.slane %v763_v43, 5 }
 0x246   :  { %v799_v52 = vor.u32 %v798_v59, %v794_v58  ;;  %v1039_v62 = vunpack.c.l.b16 %v1013_v60  ;;  %v816_v44 = vshll.u32 %v763_v43, 16  ;;  %v809_v10 = vrot.slane %v807_v54, 4 }
 0x247   :  { %v790_v24 = vrot.slane %v789_v53, 4  ;;  %v812_v11 = vrot.slane %v810_v1, 5  ;;  %v820_v5 = vshrl.u32 %v763_v43, 16  ;;  %v1018_v16 = vrot.slane %v1016_v7, 4 }
 0x248   :  { %v800_v63 = vrot.slane %v799_v52, 4  ;;  %v1042_v0 = vpack.c.b16 %v1039_v62, %v1038_v61  ;;  %v818_v12 = vrot.slane %v816_v44, 5  ;;  %v1911_v21 = vrot.slane %v1002_v28, 9 }
 0x249   :  { %v795_v25 = vsel %vm2403_vm11, %v790_v24, %v794_v58  ;;  %v822_v15 = vrot.slane %v820_v5, 4  ;;  %v813_v17 = vor.u32 %v812_v11, %v809_v10  ;;  %v1019_v29 = vrot.slane %v781_v14, 5 }
 0x24a   :  { %v805_v8 = vsel %vm2403_vm11, %v800_v63, %v804_v6  ;;  %v847_v9 = vunpack.c.l.b16 %v795_v25  ;;  %1102 = vmatmul.bf16.vlgmr.msrb.gmra.mxu3 %v1042_v0  ;;  %v826_v22 = vshll.u32 %v781_v14, 16  ;;  %v1017_v34 = vsel %vm2421_vm14, %v1911_v21, %v1016_v7 }
 0x24b   :  { %v848_v27 = vunpack.c.l.b16 %v805_v8  ;;  %v823_v19 = vor.u32 %v822_v15, %v818_v12  ;;  %v1020_v32 = vsel %vm2421_vm14, %v1018_v16, %v1019_v29  ;;  %v814_v31 = vrot.slane %v813_v17, 4 }
 0x24c   :  { %v828_v40 = vrot.slane %v826_v22, 5  ;;  %v1041_v3 = vunpack.c.l.b16 %v1020_v32  ;;  %v1040_v48 = vunpack.c.l.b16 %v1017_v34 }
 0x24d   :  { %v851_v13 = vpack.c.b16 %v848_v27, %v847_v9  ;;  %v824_v33 = vrot.slane %v823_v19, 4  ;;  %v819_v45 = vsel %vm2403_vm11, %v814_v31, %v818_v12 }
 0x24e   :  { %v1043_v49 = vpack.c.b16 %v1041_v3, %v1040_v48  ;;  %v849_v50 = vunpack.c.l.b16 %v819_v45 }
 0x24f   :  { %911 = vmatmul.bf16.vlgmr.msrb.gmra.mxu1 %v851_v13  ;;  %v829_v46 = vsel %vm2403_vm11, %v824_v33, %v828_v40  ;;  %v2113_v33 = vld [vmem:[#allocation8 + $0x38] sm:$0xff] }
 0x250   :  { %v850_v36 = vunpack.c.l.b16 %v829_v46  ;;  %1559 = vmatpush.bf16.msra.mxu1 %v2113_v33  ;;  %v2112_v46 = vld [vmem:[#allocation8 + $0x30] sm:$0xff] }
 0x252   :  { %995 = vmatmul.bf16.gmra.mxu2 %v2079_v26  ;;  %v852_v51 = vpack.c.b16 %v850_v36, %v849_v50  ;;  %v2121_v50 = vld [vmem:[#allocation8 + $0x78] sm:$0xff]  ;;  %v2128_v36 = vld [vmem:[#allocation8 + $0xb0] sm:$0xff] }
 0x253   :  { %1480 = vmatpush.bf16.msra.mxu3 %v2121_v50 }
 0x254   :  { %1560 = vmatpush.bf16.msra.mxu1 %v2112_v46 }
 0x25a   :  { %1107 = vmatmul.bf16.gmra.mxu3 %v1043_v49  ;;  %v2111_v49 = vld [vmem:[#allocation8 + $0x28] sm:$0xff] }
 0x25b   :  { %1561 = vmatpush.bf16.msra.mxu1 %v2111_v49 }
 0x25f   :  { %916 = vmatmul.bf16.gmra.mxu1 %v852_v51  ;;  %v2110_v51 = vld [vmem:[#allocation8 + $0x20] sm:$0xff] }
 0x260   :  { %1562 = vmatpush.bf16.msra.mxu1 %v2110_v51 }
 0x2c5   :  { %v991_v55 = vpop.f32.mrf.mxu2 }
 0x2cc   :  { %v912_v56 = vpop.f32.mrf.mxu1 }
 0x2cd   :  { %v1103_v38 = vpop.f32.mrf.mxu3  ;;  %v993_v41 = vpop.f32.mrf.mxu2  ;;  %v992_v59 = vadd.f32 %v991_v55, %v912_v56 }
 0x2cf   :  { %v2656_v52 = vadd.f32 %v1103_v38, %v992_v59  ;;  %v2120_v38 = vld [vmem:[#allocation8 + $0x70] sm:$0xff] }
 0x2d0   :  { %1481 = vmatpush.bf16.msra.mxu3 %v2120_v38  ;;  %v2108_v59 = vld [vmem:[#allocation8 + $0x10] sm:$0xff] }
 0x2d1   :  { %v1128_v62 = vmul.f32 %v2656_v52, %v2656_v52 }
 0x2d4   :  { %v914_v39 = vpop.f32.mrf.mxu1 }
 0x2d5   :  { %v1105_v20 = vpop.f32.mrf.mxu3  ;;  %v996_v42 = vpop.f32.mrf.mxu2  ;;  %v994_v57 = vadd.f32 %v993_v41, %v914_v39  ;;  %v2127_v41 = vld [vmem:[#allocation8 + $0xa8] sm:$0xff] }
 0x2d7   :  { %v2654_v60 = vadd.f32 %v1105_v20, %v994_v57  ;;  %v2109_v20 = vld [vmem:[#allocation8 + $0x18] sm:$0xff]  ;;  %v2119_v57 = vld [vmem:[#allocation8 + $0x68] sm:$0xff] }
 0x2d8   :  { %1563 = vmatpush.bf16.msra.mxu1 %v2109_v20  ;;  %1482 = vmatpush.bf16.msra.mxu3 %v2119_v57 }
 0x2d9   :  { %v1129_v54 = vmul.f32 %v2654_v60, %v2654_v60  ;;  %v1119_v24 = vadd.f32 %v2654_v60, %v2656_v52 }
 0x2db   :  { %v1132_v25 = vadd.f32 %v1129_v54, %v1128_v62  ;;  %v2125_v54 = vld [vmem:[#allocation8 + $0x98] sm:$0xff]  ;;  %v2107_v62 = vld [vmem:[#allocation8 + $0x8] sm:$0xff] }
 0x2dc   :  { %v917_v58 = vpop.f32.mrf.mxu1  ;;  %1564 = vmatpush.bf16.msra.mxu1 %v2108_v59  ;;  %v1327_v59 = vld [vmem:[#allocation2 + $0x8] sm:$0x1] }
 0x2dd   :  { %v997_v53 = vadd.f32 %v996_v42, %v917_v58  ;;  %v1108_v23 = vpop.f32.mrf.mxu3  ;;  %v998_v1 = vpop.f32.mrf.mxu2  ;;  %v2126_v58 = vld [vmem:[#allocation8 + $0xa0] sm:$0xff] }
 0x2df   :  { %v2658_v43 = vadd.f32 %v1108_v23, %v997_v53  ;;  %v2118_v23 = vld [vmem:[#allocation8 + $0x60] sm:$0xff] }
 0x2e0   :  { %1483 = vmatpush.bf16.msra.mxu3 %v2118_v23  ;;  %1565 = vmatpush.bf16.msra.mxu1 %v2107_v62 }
 0x2e1   :  { %v1130_v63 = vmul.f32 %v2658_v43, %v2658_v43  ;;  %v1120_v7 = vadd.f32 %v1119_v24, %v2658_v43 }
 0x2e3   :  { %v1133_v8 = vadd.f32 %v1132_v25, %v1130_v63  ;;  %v2124_v25 = vld [vmem:[#allocation8 + $0x90] sm:$0xff] }
 0x2e4   :  { %v919_v61 = vpop.f32.mrf.mxu1 }
 0x2e5   :  { %v999_v6 = vadd.f32 %v998_v1, %v919_v61  ;;  %v1110_v0 = vpop.f32.mrf.mxu3  ;;  %v1117_v1 = vld [vmem:[%s2741_s7] sm:$0x1] }
 0x2e7   :  { %v2669_v44 = vadd.f32 %v1110_v0, %v999_v6  ;;  %v2117_v6 = vld [vmem:[#allocation8 + $0x58] sm:$0xff]  ;;  %v1118_v0 = vld [vmem:[%s2742_s8] sm:$0x1] }
 0x2e8   :  { %1484 = vmatpush.bf16.msra.mxu3 %v2117_v6 }
 0x2e9   :  { %v1121_v9 = vadd.f32 %v1120_v7, %v2669_v44  ;;  %v1131_v10 = vmul.f32 %v2669_v44, %v2669_v44  ;;  %v2106_v7 = vld [vmem:[#allocation8] sm:$0xff] }
 0x2ea   :  { %1566 = vmatpush.bf16.msra.mxu1 %v2106_v7 }
 0x2eb   :  { %v1122_v11 = vrot.slane %v1121_v9, 4  ;;  %v1134_v27 = vadd.f32 %v1133_v8, %v1131_v10 }
 0x2ed   :  { %v1123_v12 = vadd.f32 %v1122_v11, %v1121_v9  ;;  %v1135_v5 = vrot.slane %v1134_v27, 4  ;;  %v2116_v11 = vld [vmem:[#allocation8 + $0x50] sm:$0xff] }
 0x2ee   :  { %1485 = vmatpush.bf16.msra.mxu3 %v2116_v11 }
 0x2ef   :  { %v1124_v13 = vrot.slane %v1123_v12, 2  ;;  %v1136_v14 = vadd.f32 %v1135_v5, %v1134_v27 }
 0x2f1   :  { %v1125_v28 = vadd.f32 %v1124_v13, %v1123_v12  ;;  %v1137_v15 = vrot.slane %v1136_v14, 2  ;;  %v2123_v12 = vld [vmem:[#allocation8 + $0x88] sm:$0xff] }
 0x2f3   :  { %v1126_v16 = vrot.slane %v1125_v28, 1  ;;  %v1138_v17 = vadd.f32 %v1137_v15, %v1136_v14 }
 0x2f5   :  { %v1127_v19 = vadd.f32 %v1126_v16, %v1125_v28  ;;  %v1139_v21 = vrot.slane %v1138_v17, 1 }
 0x2f7   :  { %1173 = vmatmul.f32.vlgmr.msrb.gmra.mxu0 %v1127_v19  ;;  %v1140_v29 = vadd.f32 %v1139_v21, %v1138_v17  ;;  %v2115_v21 = vld [vmem:[#allocation8 + $0x48] sm:$0xff] }
 0x2f8   :  { %1240 = vmatpush.msrb.mxu0 %v2552_v47  ;;  %v2129_v47 = vld [vmem:[#allocation8 + $0xb8] sm:$0xff]  ;;  %1486 = vmatpush.bf16.msra.mxu3 %v2115_v21 }
 0x2f9   :  { %1218 = vmatmul.f32.vlgmr.msrb.gmra.mxu2 %v1140_v29  ;;  %v2122_v29 = vld [vmem:[#allocation8 + $0x80] sm:$0xff] }
 0x2fa   :  { %1671 = vmatpush.bf16.msra.mxu2 %v2129_v47 }
 0x2fe   :  { %1672 = vmatpush.bf16.msra.mxu2 %v2128_v36 }
 0x302   :  { %1673 = vmatpush.bf16.msra.mxu2 %v2127_v41 }
 0x306   :  { %1674 = vmatpush.bf16.msra.mxu2 %v2126_v58 }
 0x30a   :  { %1675 = vmatpush.bf16.msra.mxu2 %v2125_v54 }
 0x30e   :  { %1676 = vmatpush.bf16.msra.mxu2 %v2124_v25 }
 0x312   :  { %1677 = vmatpush.bf16.msra.mxu2 %v2123_v12 }
 0x316   :  { %1678 = vmatpush.bf16.msra.mxu2 %v2122_v29 }
 0x374   :  { %v1174_v22 = vpop.f32.mrf.mxu0 }
 0x375   :  { %1944 = vmatmul.msk.f32.vlgmr.msra.gmra.mxu0 %vm600_vm15, %v1174_v22 }
 0x37c   :  { %v1219_v26 = vpop.f32.mrf.mxu2 }
 0x37d   :  { %1945 = vmatmul.msk.f32.vlgmr.msrb.gmra.mxu0 %vm600_vm15, %v1219_v26 }
 0x3f2   :  { %v1198_v32 = vpop.f32.mrf.mxu0 }
 0x3f3   :  { %v1201_v31 = vmul.f32 0.001953125, %v1198_v32 }
 0x3f5   :  { %v1246_v40 = vmul.f32 %v1201_v31, %v1201_v31 }
 0x3fa   :  { %v1242_v34 = vpop.f32.mrf.mxu0 }
 0x3fb   :  { %v1245_v3 = vmul.f32 0.001953125, %v1242_v34 }
 0x3fd   :  { %v1247_v45 = vsub.f32 %v1245_v3, %v1246_v40 }
 0x3ff   :  { %v1248_v48 = vadd.f32 1e-05, %v1247_v45 }
 0x401   :  { %2141 = vrsqrt.f32 %v1248_v48  ;;  %vm1255_vm5 = vweird.f32 %v1248_v48 }
 0x407   :  { %v2142_v55 = vpop.eup %2141 }
 0x408   :  { %v1250_v56 = vmul.f32 %v2142_v55, %v1248_v48  ;;  %vm1256_vm4 = vweird.f32 %v2142_v55 }
 0x409   :  { %vm1257_vm6 = vmor %vm1255_vm5, %vm1256_vm4 }
 0x40a   :  { %v1251_v39 = vmul.f32 %v2142_v55, %v1250_v56 }
 0x40c   :  { %v1252_v42 = vmul.f32 0.5, %v1251_v39 }
 0x40e   :  { %v1253_v53 = vsub.f32 1.5, %v1252_v42 }
 0x410   :  { %v1254_v61 = vmul.f32 %v2142_v55, %v1253_v53 }
 0x412   :  { %v1258_v24 = vsel %vm1257_vm6, %v2142_v55, %v1254_v61 }
 0x413   :  { %v1259_v63 = vmul.f32 %v1258_v24, %v1117_v1  ;;  %v1330_v1 = vld [vmem:[#allocation2 + $0xc] sm:$0xf]  ;;  %v1334_v24 = vld [vmem:[#allocation2 + $0x14] sm:$0x1] }
 0x415   :  { %v1260_v8 = vmul.f32 %v1259_v63, %v1201_v31  ;;  %v1263_v9 = vperm.slane %v1259_v63, 0 }
 0x417   :  { %v1261_v10 = vsub.f32 %v1118_v0, %v1260_v8  ;;  %v1265_v27 = vmul.f32 %v1263_v9, %v2656_v52  ;;  %v1266_v5 = vmul.f32 %v1263_v9, %v2654_v60  ;;  %v1267_v13 = vmul.f32 %v1263_v9, %v2658_v43  ;;  %v2114_v43 = vld [vmem:[#allocation8 + $0x40] sm:$0xff] }
 0x418   :  { %v1268_v14 = vmul.f32 %v1263_v9, %v2669_v44  ;;  %1487 = vmatpush.bf16.msra.mxu3 %v2114_v43 }
 0x419   :  { %v1270_v28 = vperm.slane %v1261_v10, 0 }
 0x41b   :  { %v1272_v15 = vadd.f32 %v1270_v28, %v1265_v27  ;;  %v1273_v16 = vadd.f32 %v1270_v28, %v1266_v5  ;;  %v1274_v17 = vadd.f32 %v1270_v28, %v1267_v13  ;;  %v1275_v19 = vadd.f32 %v1270_v28, %v1268_v14 }
 0x41d   :  { %v1276_v22 = vmax.f32 %v1272_v15, 0.0  ;;  %v1277_v52 = vmax.f32 %v1273_v16, 0.0  ;;  %v1278_v26 = vmax.f32 %v1274_v17, 0.0  ;;  %v1279_v32 = vmax.f32 %v1275_v19, 0.0 }
 0x41f   :  { %v1280_v31 = vpack.c.bf16 %v1276_v22, %v1276_v22  ;;  %v1281_v33 = vpack.c.bf16 %v1277_v52, %v1277_v52  ;;  %v1282_v60 = vpack.c.bf16 %v1278_v26, %v1278_v26  ;;  %v1283_v34 = vpack.c.bf16 %v1279_v32, %v1279_v32 }
 0x421   :  { %v1285_v44 = vshrl.u32 %v1280_v31, 16  ;;  %v1293_v40 = vshrl.u32 %v1281_v33, 16  ;;  %v1302_v3 = vshrl.u32 %v1282_v60, 16  ;;  %v1310_v45 = vshrl.u32 %v1283_v34, 16 }
 0x422   :  { %v1288_v48 = vshll.u32 %v1280_v31, 16  ;;  %v1296_v49 = vshll.u32 %v1281_v33, 16  ;;  %v1305_v36 = vshll.u32 %v1282_v60, 16  ;;  %v1313_v55 = vshll.u32 %v1283_v34, 16 }
 0x423   :  { %v1287_v46 = vrot.slane %v1285_v44, 7  ;;  %v1295_v47 = vrot.slane %v1293_v40, 7  ;;  %v1304_v50 = vrot.slane %v1302_v3, 7  ;;  %v1312_v51 = vrot.slane %v1310_v45, 7 }
 0x425   :  { %v1290_v56 = vor.u32 %v1288_v48, %v1287_v46  ;;  %v1291_v38 = vrot.slane %v1287_v46, 4  ;;  %v1298_v41 = vor.u32 %v1296_v49, %v1295_v47  ;;  %v1300_v39 = vrot.slane %v1295_v47, 4 }
 0x426   :  { %v1307_v20 = vor.u32 %v1305_v36, %v1304_v50  ;;  %v1308_v42 = vrot.slane %v1304_v50, 4  ;;  %v1315_v57 = vor.u32 %v1313_v55, %v1312_v51  ;;  %v1317_v58 = vrot.slane %v1312_v51, 4 }
 0x427   :  { %v1299_v53 = vsel %vm2366_vm7, %v1291_v38, %v1298_v41  ;;  %v1324_v23 = vsel %vm2374_vm8, %v1290_v56, %v2631_v35  ;;  %v1328_v54 = vsel %vm2337_vm3, %v1300_v39, %v1327_v59 }
 0x428   :  { %v1331_v61 = vsel %vm2374_vm8, %v1307_v20, %v1330_v1  ;;  %1325 = vst [vmem:[#allocation2] sm:$0xf] %v1324_v23  ;;  %v1316_v62 = vsel %vm2366_vm7, %v1308_v42, %v1315_v57  ;;  %v1335_v63 = vsel %vm2337_vm3, %v1317_v58, %v1334_v24 }
 0x429   :  { %1326 = vst [vmem:[#allocation2 + $0x4] sm:$0xf] %v1299_v53 }
 0x42a   :  { %1329 = vst [vmem:[#allocation2 + $0x8] sm:$0x1] %v1328_v54 }
 0x42b   :  { %1332 = vst [vmem:[#allocation2 + $0xc] sm:$0xf] %v1331_v61 }
 0x42c   :  { %1333 = vst [vmem:[#allocation2 + $0x10] sm:$0xf] %v1316_v62 }
 0x42d   :  { %1336 = vst [vmem:[#allocation2 + $0x14] sm:$0x1] %v1335_v63 }
 0x42f   :  { %v1578_v35 = vld [vmem:[#allocation2] sm:$0xe] }
 0x430   :  { %v1337_v6 = vld [vmem:[#allocation2] sm:$0xf]  ;;  %v1338_v25 = vld [vmem:[#allocation2 + $0x4] sm:$0xf]  ;;  %v2018_v7 = vrot.slane %v1578_v35, 9 }
 0x431   :  { %v2104_v0 = vld [vmem:[#allocation2] sm:$0xff]  ;;  %v1360_v37 = vshrl.u32 %v1337_v6, 16  ;;  %v1363_v8 = vshll.u32 %v1337_v6, 16  ;;  %v1357_v9 = vld [vmem:[#allocation2 + $0x8] sm:$0x1]  ;;  %v1586_v10 = vrot.slane %v1338_v25, 5 }
 0x432   :  { %v1369_v30 = vshll.u32 %v1338_v25, 16  ;;  %v1373_v11 = vshrl.u32 %v1338_v25, 16  ;;  %1567 = vmatmul.bf16.vlgmr.msra.gmra.mxu1 %v2104_v0  ;;  %v1589_v27 = vrot.slane %v1357_v9, 5  ;;  %v1379_v5 = vshll.u32 %v1357_v9, 16  ;;  %v1339_v19 = vld [vmem:[#allocation2 + $0xc] sm:$0xf] }
 0x433   :  { %v1362_v12 = vrot.slane %v1360_v37, 4  ;;  %v1365_v4 = vrot.slane %v1363_v8, 5  ;;  %v1587_v13 = vsel %vm2421_vm14, %v2018_v7, %v1586_v10  ;;  %v1588_v14 = vrot.slane %v1586_v10, 4  ;;  %v1340_v17 = vld [vmem:[#allocation2 + $0x10] sm:$0xf] }
 0x434   :  { %v1371_v28 = vrot.slane %v1369_v30, 5  ;;  %v1375_v15 = vrot.slane %v1373_v11, 4  ;;  %v1615_v29 = vunpack.c.l.b16 %v1587_v13  ;;  %v1384_v32 = vshrl.u32 %v1339_v19, 16  ;;  %v1358_v51 = vld [vmem:[#allocation2 + $0x14] sm:$0x1]  ;;  %v2105_v58 = vld [vmem:[#allocation2 + $0xc] sm:$0xff] }
 0x435   :  { %v1366_v16 = vor.u32 %v1365_v4, %v1362_v12  ;;  %v1590_v21 = vsel %vm2421_vm14, %v1588_v14, %v1589_v27  ;;  %v1387_v31 = vshll.u32 %v1339_v19, 16  ;;  %v1381_v60 = vrot.slane %v1379_v5, 5  ;;  %v1579_v55 = vld [vmem:[#allocation2 + $0xc] sm:$0xe]  ;;  %v2138_v9 = vld [vmem:[%s2738_s4] ss:$0 sm:$0xff] }
 0x436   :  { %v1376_v22 = vor.u32 %v1375_v15, %v1371_v28  ;;  %v1616_v52 = vunpack.c.l.b16 %v1590_v21  ;;  %v1393_v34 = vshll.u32 %v1340_v17, 16  ;;  %v1593_v40 = vrot.slane %v1340_v17, 5  ;;  %v2143_v27 = vld [vmem:[%s2734_s0] sm:$0xff]  ;;  %v2144_v15 = vld [vmem:[%s2734_s0 + $0x8] sm:$0xff] }
 0x437   :  { %v1367_v26 = vrot.slane %v1366_v16, 4  ;;  %v1386_v46 = vrot.slane %v1384_v32, 4  ;;  %v1389_v48 = vrot.slane %v1387_v31, 5  ;;  %v1397_v50 = vshrl.u32 %v1340_v17, 16 }
 0x438   :  { %v1377_v33 = vrot.slane %v1376_v22, 4  ;;  %v1619_v43 = vpack.c.b16 %v1616_v52, %v1615_v29  ;;  %v1395_v49 = vrot.slane %v1393_v34, 5  ;;  %v1595_v38 = vrot.slane %v1593_v40, 4  ;;  %v2145_v52 = vld [vmem:[%s2734_s0 + $0x10] sm:$0xff] }
 0x439   :  { %v1372_v44 = vsel %vm2403_vm11, %v1367_v26, %v1371_v28  ;;  %v1399_v56 = vrot.slane %v1397_v50, 4  ;;  %v1390_v41 = vor.u32 %v1389_v48, %v1386_v46  ;;  %v2019_v20 = vrot.slane %v1579_v55, 9 }
 0x43a   :  { %v1382_v3 = vsel %vm2403_vm11, %v1377_v33, %v1381_v60  ;;  %v1424_v45 = vunpack.c.l.b16 %v1372_v44  ;;  %1679 = vmatmul.bf16.vlgmr.msra.gmra.mxu2 %v1619_v43  ;;  %v1596_v42 = vrot.slane %v1358_v51, 5  ;;  %v1403_v57 = vshll.u32 %v1358_v51, 16  ;;  %v2146_v44 = vld [vmem:[%s2734_s0 + $0x18] sm:$0xff] }
 0x43b   :  { %v1425_v47 = vunpack.c.l.b16 %v1382_v3  ;;  %v1400_v39 = vor.u32 %v1399_v56, %v1395_v49  ;;  %v1391_v53 = vrot.slane %v1390_v41, 4  ;;  %v1594_v54 = vsel %vm2421_vm14, %v2019_v20, %v1593_v40 }
 0x43c   :  { %v1597_v59 = vsel %vm2421_vm14, %v1595_v38, %v1596_v42  ;;  %v1405_v1 = vrot.slane %v1403_v57, 5  ;;  %v1617_v63 = vunpack.c.l.b16 %v1594_v54 }
 0x43d   :  { %v1428_v36 = vpack.c.b16 %v1425_v47, %v1424_v45  ;;  %v1401_v23 = vrot.slane %v1400_v39, 4  ;;  %v1618_v61 = vunpack.c.l.b16 %v1597_v59  ;;  %v1396_v62 = vsel %vm2403_vm11, %v1391_v53, %v1395_v49 }
 0x43e   :  { %v1426_v6 = vunpack.c.l.b16 %v1396_v62 }
 0x43f   :  { %1488 = vmatmul.bf16.vlgmr.msra.gmra.mxu3 %v1428_v36  ;;  %v1406_v24 = vsel %vm2403_vm11, %v1401_v23, %v1405_v1  ;;  %v1620_v35 = vpack.c.b16 %v1618_v61, %v1617_v63 }
 0x440   :  { %v1427_v0 = vunpack.c.l.b16 %v1406_v24 }
 0x442   :  { %1572 = vmatmul.bf16.gmra.mxu1 %v2105_v58  ;;  %v1429_v25 = vpack.c.b16 %v1427_v0, %v1426_v6 }
 0x44a   :  { %1684 = vmatmul.bf16.gmra.mxu2 %v1620_v35 }
 0x44f   :  { %1493 = vmatmul.bf16.gmra.mxu3 %v1429_v25 }
 0x4af   :  { %v1568_v7 = vpop.f32.mrf.mxu1 }
 0x4b7   :  { %v1570_v30 = vpop.f32.mrf.mxu1 }
 0x4bd   :  { %v1680_v37 = vpop.f32.mrf.mxu2 }
 0x4bf   :  { %v1573_v28 = vpop.f32.mrf.mxu1 }
 0x4c2   :  { %v1489_v8 = vpop.f32.mrf.mxu3 }
 0x4c3   :  { %v1569_v2 = vadd.f32 %v1568_v7, %v1489_v8 }
 0x4c5   :  { %v1690_v10 = vadd.f32 %v1680_v37, %v1569_v2  ;;  %v1682_v18 = vpop.f32.mrf.mxu2 }
 0x4c7   :  { %v1698_v11 = vadd.f32 %v2138_v9, %v1690_v10  ;;  %v1575_v32 = vpop.f32.mrf.mxu1 }
 0x4c9   :  { %v1702_v12 = vadd.f32 %v2143_v27, %v1698_v11 }
 0x4ca   :  { %v1491_v4 = vpop.f32.mrf.mxu3 }
 0x4cb   :  { %1706 = vst [vmem:[#allocation9] sm:$0xff] %v1702_v12  ;;  %v1571_v5 = vadd.f32 %v1570_v30, %v1491_v4 }
 0x4cd   :  { %v1691_v13 = vadd.f32 %v1682_v18, %v1571_v5  ;;  %v1685_v17 = vpop.f32.mrf.mxu2 }
 0x4cf   :  { %v1699_v14 = vadd.f32 %v2138_v9, %v1691_v13 }
 0x4d1   :  { %v1703_v16 = vadd.f32 %v2144_v15, %v1699_v14 }
 0x4d2   :  { %v1494_v19 = vpop.f32.mrf.mxu3 }
 0x4d3   :  { %1707 = vst [vmem:[#allocation9 + $0x8] sm:$0xff] %v1703_v16  ;;  %v1574_v21 = vadd.f32 %v1573_v28, %v1494_v19 }
 0x4d5   :  { %v1692_v29 = vadd.f32 %v1685_v17, %v1574_v21  ;;  %v1687_v60 = vpop.f32.mrf.mxu2 }
 0x4d7   :  { %v1700_v22 = vadd.f32 %v2138_v9, %v1692_v29 }
 0x4d9   :  { %v1704_v26 = vadd.f32 %v2145_v52, %v1700_v22 }
 0x4da   :  { %v1496_v31 = vpop.f32.mrf.mxu3 }
 0x4db   :  { %1708 = vst [vmem:[#allocation9 + $0x10] sm:$0xff] %v1704_v26  ;;  %v1576_v33 = vadd.f32 %v1575_v32, %v1496_v31 }
 0x4dd   :  { %v1693_v34 = vadd.f32 %v1687_v60, %v1576_v33 }
 0x4df   :  { %v1701_v43 = vadd.f32 %v2138_v9, %v1693_v34 }
 0x4e1   :  { %v1705_v40 = vadd.f32 %v2146_v44, %v1701_v43 }
 0x4e3   :  { %1709 = vst [vmem:[#allocation9 + $0x18] sm:$0xff] %v1705_v40 }
 0x4e4   :  { %1722 = dma.vmem_to_hbm [thread:$0]  %s1715_s9, 512, %s1717_s29, [#allocation5], %s2255_s15, %s2255_s15, %s2256_s16  }
 0x4e5   :  { %2247 = dma.done.wait [#allocation5], 512  }
 0x4e6   :  { %2248 = vsyncadd [#allocation5], 4294966784 }
 0x4e7   :  { %1727 = vsyncpa [#allocation4], 1 }
 0x4e8   :  { %1728 = vsyncpa [#allocation7], 1 }
 0x4e9   :  { %1729 = vsyncpa [#allocation5], 1 }

</bundles_post_ra>
